<compile_context>
chip_gen: v5e
topology: v5e:2x2
jax: 0.10.0
libtpu: 0.0.40
codegen_flags: <defaults>
</compile_context>

<pallas_src>
import jax
import jax.numpy as jnp
from jax.experimental import pallas as pl
from jax.experimental.pallas import tpu as pltpu


def _make_kernel(num_layers, b_blk, matmul_dtype):
    """Kernel closure for a fixed number of grouped-conv layers.

    Refs layout: x_ref, (w_ref, b_ref) * num_layers, o_ref.
      x_ref block : (B_BLK, G_BLK*order, L_TILE)   channels on sublanes, L on lanes
      w_ref block : (1, G_BLK*out_l, G_BLK*in_l)   block-diagonal packed weights (bf16)
      b_ref block : (1, G_BLK*out_l, 1)            f32
      o_ref block : (B_BLK, G_BLK*out_last, L_TILE)
    """

    def kernel(*refs):
        x_ref = refs[0]
        o_ref = refs[-1]
        for bi in range(b_blk):                       # short fixed unroll over batch
            h = x_ref[bi]                             # (G_BLK*in0, L_TILE)
            for li in range(num_layers):
                w = refs[1 + 2 * li][0]               # (G_BLK*out, G_BLK*in) bf16
                b = refs[2 + 2 * li][0]               # (G_BLK*out, 1) f32
                h = jnp.dot(w, h.astype(matmul_dtype),
                            preferred_element_type=jnp.float32) + b
                if li < num_layers - 1:               # ReLU on all but last layer
                    h = jnp.maximum(h, 0.0)
            o_ref[bi] = h.astype(o_ref.dtype)

    return kernel


def _vmem_limit_bytes():
    """Scoped VMEM limit: 3/4 of physical, capped at 96 MiB (v7x -> ~48 MiB)."""
    try:
        cap = pltpu.get_tpu_info().vmem_capacity_bytes
    except Exception:
        cap = 64 * 1024 * 1024                        # assume smallest (v7x)
    return int(min(96 * 1024 * 1024, cap * 3 // 4))


def _choose_group_block(G, order, out_last, target=8):
    """Return (g_blk, G_pad). g_blk is capped to bound block-diagonal FLOP waste."""
    if G <= target:
        return G, G                                   # full-extent channel blocks
    for cand in range(target, 0, -1):
        if G % cand == 0 and (cand * order) % 8 == 0 and (cand * out_last) % 8 == 0:
            return cand, G
    # No divisor gives 8-aligned channel blocks -> zero-pad the group dim so the
    # packed weights stay O(target^2) instead of O(G^2).
    return target, ((G + target - 1) // target) * target


def _choose_data_tiles(B, L, g_blk, order, out_last, max_dim, x_bytes, budget):
    """Pick (B_BLK, L_TILE) so the per-step working set fits `budget` bytes."""
    # Per-(batch row, lane column) footprint: double-buffered x/out blocks plus
    # ~3 f32 intermediates of the largest layer of the matmul chain.
    col_bytes = g_blk * (2 * order * x_bytes + 2 * out_last * x_bytes
                         + 3 * max_dim * 4)
    cols = max(128, min(16384, budget // col_bytes))  # total columns per step

    l_cap = pl.cdiv(L, 128) * 128                     # L rounded up to full lanes
    l_tile = max(128, min((cols // 128) * 128, l_cap))
    b_blk = int(min(B, max(1, cols // l_tile), 8))
    return b_blk, l_tile


def concept_nn_nary_forward(x, weights, biases, order, num_mlps,
                            matmul_dtype=jnp.bfloat16):
    """Forward pass of ConceptNNNary (first_layer='linear', no dropout/batchnorm).

    Args:
      x: (B, order * num_mlps, L)  -- NCW, same as the PyTorch module (f32 or bf16).
      weights[i]: (num_mlps, out_i, in_i)  -- per-group 1x1-conv weight.
      biases[i]:  (num_mlps, 1, out_i)     -- per-group bias.
    Returns:
      (B, num_mlps * out_last, L); out_last == 1 for this module -> (B, num_mlps, L).
    """
    B, C, L = x.shape
    G = num_mlps
    assert C == order * G
    num_layers = len(weights)
    out_last = weights[-1].shape[1]                   # == 1 for this module
    layer_dims = [order] + [w.shape[1] for w in weights]
    max_dim = max(layer_dims)

    g_blk, G_pad = _choose_group_block(G, order, out_last)
    if G_pad != G:
        # TODO(synk): rare path (num_mlps has no 8-aligned divisor) — zero-pads
        # the group dim; costs one extra pass over x but keeps blocks bounded.
        pad_g = G_pad - G
        x = jnp.pad(x, ((0, 0), (0, pad_g * order), (0, 0)))
        weights = [jnp.pad(w, ((0, pad_g), (0, 0), (0, 0))) for w in weights]
        biases = [jnp.pad(b, ((0, pad_g), (0, 0), (0, 0))) for b in biases]
    n_gb = G_pad // g_blk

    x_bytes = jnp.dtype(x.dtype).itemsize
    w_bytes = jnp.dtype(matmul_dtype).itemsize
    weight_vmem = 2 * sum(
        g_blk * g_blk * w.shape[1] * w.shape[2] * w_bytes + g_blk * w.shape[1] * 4
        for w in weights)
    vmem_limit = _vmem_limit_bytes()
    budget = max(6 * 1024 * 1024, vmem_limit // 2 - weight_vmem)

    b_blk, l_tile = _choose_data_tiles(B, L, g_blk, order, out_last, max_dim,
                                       x_bytes, budget)
    n_bb = pl.cdiv(B, b_blk)
    n_lt = pl.cdiv(L, l_tile)

    # --- Pack per-group weights into per-group-block block-diagonal matrices.
    # Parameter-sized, one-shot wrapper work (would be cached in a real model);
    # each layer then runs as ONE well-shaped MXU matmul per grid step.
    bd_ws, bd_bs = [], []
    eye = jnp.eye(g_blk, dtype=jnp.float32)
    for w, b in zip(weights, biases):
        out_d, in_d = w.shape[1], w.shape[2]
        wr = w.reshape(n_gb, g_blk, out_d, in_d).astype(jnp.float32)
        bd = wr[:, :, None, :, :] * eye[None, :, :, None, None]   # (n, g, h, o, i)
        bd = bd.transpose(0, 1, 3, 2, 4).reshape(n_gb, g_blk * out_d, g_blk * in_d)
        bd_ws.append(bd.astype(matmul_dtype))                     # bf16 weights
        bd_bs.append(b.reshape(n_gb, g_blk * out_d, 1).astype(jnp.float32))

    # --- BlockSpecs: read/write directly in NCW, channels on sublanes, L on lanes.
    in_specs = [pl.BlockSpec((b_blk, g_blk * order, l_tile),
                             lambda g, b, l: (b, g, l))]
    for w_bd, b_bd in zip(bd_ws, bd_bs):
        mw, kw = w_bd.shape[1], w_bd.shape[2]
        in_specs.append(pl.BlockSpec((1, mw, kw), lambda g, b, l: (g, 0, 0)))
        in_specs.append(pl.BlockSpec((1, mw, 1), lambda g, b, l: (g, 0, 0)))
    out_spec = pl.BlockSpec((b_blk, g_blk * out_last, l_tile),
                            lambda g, b, l: (b, g, l))

    flat_params = [a for wb in zip(bd_ws, bd_bs) for a in wb]

    out = pl.pallas_call(
        _make_kernel(num_layers, b_blk, matmul_dtype),
        out_shape=jax.ShapeDtypeStruct((B, G_pad * out_last, L), x.dtype),
        grid_spec=pltpu.PrefetchScalarGridSpec(
            num_scalar_prefetch=0,
            grid=(n_gb, n_bb, n_lt),       # weights stay resident across B/L steps
            in_specs=in_specs,
            out_specs=out_spec,
        ),
        compiler_params=pltpu.CompilerParams(
            dimension_semantics=("parallel", "parallel", "parallel"),
            vmem_limit_bytes=vmem_limit,
        ),
    )(x, *flat_params)

    if G_pad != G:
        out = out[:, : G * out_last, :]
    return out


def reference_forward(x, weights, biases, order, num_mlps):
    """Pure-JAX reference (mirrors the grouped Conv1d + ReLU stack)."""
    B, C, L = x.shape
    G = num_mlps
    h = x.reshape(B, G, order, L).astype(jnp.float32)
    for i, (w, b) in enumerate(zip(weights, biases)):
        h = jnp.einsum("goi,bgil->bgol", w, h,
                       precision=jax.lax.Precision.HIGHEST)
        h = h + b.reshape(1, G, w.shape[1], 1)
        if i < len(weights) - 1:
            h = jnp.maximum(h, 0.0)
    return h.reshape(B, G * weights[-1].shape[1], L).astype(x.dtype)


def init_params(key, order, num_mlps, hidden_dims):
    """Deterministic param init matching the grouped-conv shapes of __init__."""
    dims = [order] + list(hidden_dims) + [1]
    weights, biases = [], []
    for i in range(len(dims) - 1):
        in_d, out_d = dims[i], dims[i + 1]
        key, kw, kb = jax.random.split(key, 3)
        bound = 1.0 / jnp.sqrt(float(in_d))
        w = jax.random.uniform(kw, (num_mlps, out_d, in_d), jnp.float32, -bound, bound)
        b = jax.random.uniform(kb, (num_mlps, 1, out_d), jnp.float32, -bound, bound)
        weights.append(w)
        biases.append(b)
    return weights, biases


if __name__ == "__main__":
    # Module hyperparameters (first_layer='linear', dropout=0, batchnorm=False)
    order = 2
    num_mlps = 8
    hidden_dims = (32, 16)

    B, L = 2, 128  # small test shapes; L a multiple of 128 -> unmasked lane tiles

    key = jax.random.PRNGKey(0)
    key, kx = jax.random.split(key)
    x = jax.random.normal(kx, (B, order * num_mlps, L), dtype=jnp.float32)

    weights, biases = init_params(key, order, num_mlps, hidden_dims)

    out = concept_nn_nary_forward(x, weights, biases, order, num_mlps)
    out = jax.block_until_ready(out)

    ref = reference_forward(x, weights, biases, order, num_mlps)
    assert out.shape == (B, num_mlps, L), out.shape
    max_err = float(jnp.max(jnp.abs(out - ref)))
    # bf16 MXU matmuls (f32 accumulation) vs HIGHEST-precision f32 reference.
    assert jnp.allclose(out, ref, atol=5e-2, rtol=5e-2), f"mismatch vs reference: {max_err}"

    print("KERNEL_OK")
</pallas_src>

<mosaic_0001>
module attributes {stable_mosaic.version = 11 : i64} {
  func.func @kernel(%arg0: i32, %arg1: i32, %arg2: i32, %arg3: memref<2x16x128xf32, #tpu.memory_space<vmem>>, %arg4: memref<1x256x16xbf16, #tpu.memory_space<vmem>>, %arg5: memref<1x256x1xf32, #tpu.memory_space<vmem>>, %arg6: memref<1x128x256xbf16, #tpu.memory_space<vmem>>, %arg7: memref<1x128x1xf32, #tpu.memory_space<vmem>>, %arg8: memref<1x8x128xbf16, #tpu.memory_space<vmem>>, %arg9: memref<1x8x1xf32, #tpu.memory_space<vmem>>, %arg10: memref<2x8x128xf32, #tpu.memory_space<vmem>>) attributes {dimension_semantics = [#tpu.dimension_semantics<parallel>, #tpu.dimension_semantics<parallel>, #tpu.dimension_semantics<parallel>], iteration_bounds = array<i64: 1, 1, 1>, scalar_prefetch = 0 : i64, scratch_operands = 0 : i64, tpu.core_type = #tpu.core_type<tc>, window_params = [{transform_indices = @transform_0, window_bounds = array<i64: 2, 16, 128>}, {transform_indices = @transform_1, window_bounds = array<i64: 1, 256, 16>}, {transform_indices = @transform_2, window_bounds = array<i64: 1, 256, 1>}, {transform_indices = @transform_3, window_bounds = array<i64: 1, 128, 256>}, {transform_indices = @transform_4, window_bounds = array<i64: 1, 128, 1>}, {transform_indices = @transform_5, window_bounds = array<i64: 1, 8, 128>}, {transform_indices = @transform_6, window_bounds = array<i64: 1, 8, 1>}, {transform_indices = @transform_7, window_bounds = array<i64: 2, 8, 128>}]} {
    %c0 = arith.constant 0 : index
    %c0_0 = arith.constant 0 : index
    %c0_1 = arith.constant 0 : index
    %0 = vector.load %arg3[%c0, %c0_0, %c0_1] : memref<2x16x128xf32, #tpu.memory_space<vmem>>, vector<1x16x128xf32>
    %1 = vector.shape_cast %0 : vector<1x16x128xf32> to vector<16x128xf32>
    %c0_2 = arith.constant 0 : index
    %c0_3 = arith.constant 0 : index
    %c0_4 = arith.constant 0 : index
    %2 = vector.load %arg4[%c0_2, %c0_3, %c0_4] : memref<1x256x16xbf16, #tpu.memory_space<vmem>>, vector<1x256x16xbf16>
    %3 = vector.shape_cast %2 : vector<1x256x16xbf16> to vector<256x16xbf16>
    %c0_5 = arith.constant 0 : index
    %c0_6 = arith.constant 0 : index
    %c0_7 = arith.constant 0 : index
    %4 = vector.load %arg5[%c0_5, %c0_6, %c0_7] : memref<1x256x1xf32, #tpu.memory_space<vmem>>, vector<1x256x1xf32>
    %5 = vector.shape_cast %4 : vector<1x256x1xf32> to vector<256x1xf32>
    %6 = arith.truncf %1 : vector<16x128xf32> to vector<16x128xbf16>
    %cst = arith.constant dense<0.000000e+00> : vector<256x128xf32>
    %7 = tpu.matmul %3, %6, %cst {dimension_numbers = #tpu.dot_dimension_numbers<[1], [0], [0], [1], [0, 0, 1, 1], [], []>} : vector<256x16xbf16>, vector<16x128xbf16>, vector<256x128xf32> -> vector<256x128xf32>
    %8 = vector.broadcast %5 : vector<256x1xf32> to vector<256x128xf32>
    %9 = arith.addf %7, %8 : vector<256x128xf32>
    %cst_8 = arith.constant 0.000000e+00 : f32
    %10 = vector.broadcast %cst_8 : f32 to vector<256x128xf32>
    %11 = arith.maximumf %9, %10 : vector<256x128xf32>
    %c0_9 = arith.constant 0 : index
    %c0_10 = arith.constant 0 : index
    %c0_11 = arith.constant 0 : index
    %12 = vector.load %arg6[%c0_9, %c0_10, %c0_11] : memref<1x128x256xbf16, #tpu.memory_space<vmem>>, vector<1x128x256xbf16>
    %13 = vector.shape_cast %12 : vector<1x128x256xbf16> to vector<128x256xbf16>
    %c0_12 = arith.constant 0 : index
    %c0_13 = arith.constant 0 : index
    %c0_14 = arith.constant 0 : index
    %14 = vector.load %arg7[%c0_12, %c0_13, %c0_14] : memref<1x128x1xf32, #tpu.memory_space<vmem>>, vector<1x128x1xf32>
    %15 = vector.shape_cast %14 : vector<1x128x1xf32> to vector<128x1xf32>
    %16 = arith.truncf %11 : vector<256x128xf32> to vector<256x128xbf16>
    %cst_15 = arith.constant dense<0.000000e+00> : vector<128x128xf32>
    %17 = tpu.matmul %13, %16, %cst_15 {dimension_numbers = #tpu.dot_dimension_numbers<[1], [0], [0], [1], [0, 0, 1, 1], [], []>} : vector<128x256xbf16>, vector<256x128xbf16>, vector<128x128xf32> -> vector<128x128xf32>
    %18 = vector.broadcast %15 : vector<128x1xf32> to vector<128x128xf32>
    %19 = arith.addf %17, %18 : vector<128x128xf32>
    %cst_16 = arith.constant 0.000000e+00 : f32
    %20 = vector.broadcast %cst_16 : f32 to vector<128x128xf32>
    %21 = arith.maximumf %19, %20 : vector<128x128xf32>
    %c0_17 = arith.constant 0 : index
    %c0_18 = arith.constant 0 : index
    %c0_19 = arith.constant 0 : index
    %22 = vector.load %arg8[%c0_17, %c0_18, %c0_19] : memref<1x8x128xbf16, #tpu.memory_space<vmem>>, vector<1x8x128xbf16>
    %23 = vector.shape_cast %22 : vector<1x8x128xbf16> to vector<8x128xbf16>
    %c0_20 = arith.constant 0 : index
    %c0_21 = arith.constant 0 : index
    %c0_22 = arith.constant 0 : index
    %24 = vector.load %arg9[%c0_20, %c0_21, %c0_22] : memref<1x8x1xf32, #tpu.memory_space<vmem>>, vector<1x8x1xf32>
    %25 = vector.shape_cast %24 : vector<1x8x1xf32> to vector<8x1xf32>
    %26 = arith.truncf %21 : vector<128x128xf32> to vector<128x128xbf16>
    %cst_23 = arith.constant dense<0.000000e+00> : vector<8x128xf32>
    %27 = tpu.matmul %23, %26, %cst_23 {dimension_numbers = #tpu.dot_dimension_numbers<[1], [0], [0], [1], [0, 0, 1, 1], [], []>} : vector<8x128xbf16>, vector<128x128xbf16>, vector<8x128xf32> -> vector<8x128xf32>
    %28 = vector.broadcast %25 : vector<8x1xf32> to vector<8x128xf32>
    %29 = arith.addf %27, %28 : vector<8x128xf32>
    %c0_24 = arith.constant 0 : index
    %c0_25 = arith.constant 0 : index
    %c0_26 = arith.constant 0 : index
    %30 = vector.load %arg10[%c0_24, %c0_25, %c0_26] : memref<2x8x128xf32, #tpu.memory_space<vmem>>, vector<1x8x128xf32>
    %31 = vector.shape_cast %30 : vector<1x8x128xf32> to vector<8x128xf32>
    %32 = vector.shape_cast %29 : vector<8x128xf32> to vector<1x8x128xf32>
    tpu.vector_store %arg10[%c0_24, %c0_25, %c0_26], %32 {strides = array<i32>} : memref<2x8x128xf32, #tpu.memory_space<vmem>>, vector<1x8x128xf32>,
    %c1 = arith.constant 1 : index
    %c0_27 = arith.constant 0 : index
    %c0_28 = arith.constant 0 : index
    %33 = vector.load %arg3[%c1, %c0_27, %c0_28] : memref<2x16x128xf32, #tpu.memory_space<vmem>>, vector<1x16x128xf32>
    %34 = vector.shape_cast %33 : vector<1x16x128xf32> to vector<16x128xf32>
    %c0_29 = arith.constant 0 : index
    %c0_30 = arith.constant 0 : index
    %c0_31 = arith.constant 0 : index
    %35 = vector.load %arg4[%c0_29, %c0_30, %c0_31] : memref<1x256x16xbf16, #tpu.memory_space<vmem>>, vector<1x256x16xbf16>
    %36 = vector.shape_cast %35 : vector<1x256x16xbf16> to vector<256x16xbf16>
    %c0_32 = arith.constant 0 : index
    %c0_33 = arith.constant 0 : index
    %c0_34 = arith.constant 0 : index
    %37 = vector.load %arg5[%c0_32, %c0_33, %c0_34] : memref<1x256x1xf32, #tpu.memory_space<vmem>>, vector<1x256x1xf32>
    %38 = vector.shape_cast %37 : vector<1x256x1xf32> to vector<256x1xf32>
    %39 = arith.truncf %34 : vector<16x128xf32> to vector<16x128xbf16>
    %cst_35 = arith.constant dense<0.000000e+00> : vector<256x128xf32>
    %40 = tpu.matmul %36, %39, %cst_35 {dimension_numbers = #tpu.dot_dimension_numbers<[1], [0], [0], [1], [0, 0, 1, 1], [], []>} : vector<256x16xbf16>, vector<16x128xbf16>, vector<256x128xf32> -> vector<256x128xf32>
    %41 = vector.broadcast %38 : vector<256x1xf32> to vector<256x128xf32>
    %42 = arith.addf %40, %41 : vector<256x128xf32>
    %cst_36 = arith.constant 0.000000e+00 : f32
    %43 = vector.broadcast %cst_36 : f32 to vector<256x128xf32>
    %44 = arith.maximumf %42, %43 : vector<256x128xf32>
    %c0_37 = arith.constant 0 : index
    %c0_38 = arith.constant 0 : index
    %c0_39 = arith.constant 0 : index
    %45 = vector.load %arg6[%c0_37, %c0_38, %c0_39] : memref<1x128x256xbf16, #tpu.memory_space<vmem>>, vector<1x128x256xbf16>
    %46 = vector.shape_cast %45 : vector<1x128x256xbf16> to vector<128x256xbf16>
    %c0_40 = arith.constant 0 : index
    %c0_41 = arith.constant 0 : index
    %c0_42 = arith.constant 0 : index
    %47 = vector.load %arg7[%c0_40, %c0_41, %c0_42] : memref<1x128x1xf32, #tpu.memory_space<vmem>>, vector<1x128x1xf32>
    %48 = vector.shape_cast %47 : vector<1x128x1xf32> to vector<128x1xf32>
    %49 = arith.truncf %44 : vector<256x128xf32> to vector<256x128xbf16>
    %cst_43 = arith.constant dense<0.000000e+00> : vector<128x128xf32>
    %50 = tpu.matmul %46, %49, %cst_43 {dimension_numbers = #tpu.dot_dimension_numbers<[1], [0], [0], [1], [0, 0, 1, 1], [], []>} : vector<128x256xbf16>, vector<256x128xbf16>, vector<128x128xf32> -> vector<128x128xf32>
    %51 = vector.broadcast %48 : vector<128x1xf32> to vector<128x128xf32>
    %52 = arith.addf %50, %51 : vector<128x128xf32>
    %cst_44 = arith.constant 0.000000e+00 : f32
    %53 = vector.broadcast %cst_44 : f32 to vector<128x128xf32>
    %54 = arith.maximumf %52, %53 : vector<128x128xf32>
    %c0_45 = arith.constant 0 : index
    %c0_46 = arith.constant 0 : index
    %c0_47 = arith.constant 0 : index
    %55 = vector.load %arg8[%c0_45, %c0_46, %c0_47] : memref<1x8x128xbf16, #tpu.memory_space<vmem>>, vector<1x8x128xbf16>
    %56 = vector.shape_cast %55 : vector<1x8x128xbf16> to vector<8x128xbf16>
    %c0_48 = arith.constant 0 : index
    %c0_49 = arith.constant 0 : index
    %c0_50 = arith.constant 0 : index
    %57 = vector.load %arg9[%c0_48, %c0_49, %c0_50] : memref<1x8x1xf32, #tpu.memory_space<vmem>>, vector<1x8x1xf32>
    %58 = vector.shape_cast %57 : vector<1x8x1xf32> to vector<8x1xf32>
    %59 = arith.truncf %54 : vector<128x128xf32> to vector<128x128xbf16>
    %cst_51 = arith.constant dense<0.000000e+00> : vector<8x128xf32>
    %60 = tpu.matmul %56, %59, %cst_51 {dimension_numbers = #tpu.dot_dimension_numbers<[1], [0], [0], [1], [0, 0, 1, 1], [], []>} : vector<8x128xbf16>, vector<128x128xbf16>, vector<8x128xf32> -> vector<8x128xf32>
    %61 = vector.broadcast %58 : vector<8x1xf32> to vector<8x128xf32>
    %62 = arith.addf %60, %61 : vector<8x128xf32>
    %c1_52 = arith.constant 1 : index
    %c0_53 = arith.constant 0 : index
    %c0_54 = arith.constant 0 : index
    %63 = vector.load %arg10[%c1_52, %c0_53, %c0_54] : memref<2x8x128xf32, #tpu.memory_space<vmem>>, vector<1x8x128xf32>
    %64 = vector.shape_cast %63 : vector<1x8x128xf32> to vector<8x128xf32>
    %65 = vector.shape_cast %62 : vector<8x128xf32> to vector<1x8x128xf32>
    tpu.vector_store %arg10[%c1_52, %c0_53, %c0_54], %65 {strides = array<i32>} : memref<2x8x128xf32, #tpu.memory_space<vmem>>, vector<1x8x128xf32>,
    return
  }
  func.func @transform_0(%arg0: i32, %arg1: i32, %arg2: i32) -> (i32, i32, i32) {
    %c0_i32 = arith.constant 0 : i32
    return %arg1, %arg0, %arg2 : i32, i32, i32
  }
  func.func @transform_1(%arg0: i32, %arg1: i32, %arg2: i32) -> (i32, i32, i32) {
    %c0_i32 = arith.constant 0 : i32
    %c0_i32_0 = arith.constant 0 : i32
    %c0_i32_1 = arith.constant 0 : i32
    return %arg0, %c0_i32, %c0_i32_0 : i32, i32, i32
  }
  func.func @transform_2(%arg0: i32, %arg1: i32, %arg2: i32) -> (i32, i32, i32) {
    %c0_i32 = arith.constant 0 : i32
    %c0_i32_0 = arith.constant 0 : i32
    %c0_i32_1 = arith.constant 0 : i32
    return %arg0, %c0_i32, %c0_i32_0 : i32, i32, i32
  }
  func.func @transform_3(%arg0: i32, %arg1: i32, %arg2: i32) -> (i32, i32, i32) {
    %c0_i32 = arith.constant 0 : i32
    %c0_i32_0 = arith.constant 0 : i32
    %c0_i32_1 = arith.constant 0 : i32
    return %arg0, %c0_i32, %c0_i32_0 : i32, i32, i32
  }
  func.func @transform_4(%arg0: i32, %arg1: i32, %arg2: i32) -> (i32, i32, i32) {
    %c0_i32 = arith.constant 0 : i32
    %c0_i32_0 = arith.constant 0 : i32
    %c0_i32_1 = arith.constant 0 : i32
    return %arg0, %c0_i32, %c0_i32_0 : i32, i32, i32
  }
  func.func @transform_5(%arg0: i32, %arg1: i32, %arg2: i32) -> (i32, i32, i32) {
    %c0_i32 = arith.constant 0 : i32
    %c0_i32_0 = arith.constant 0 : i32
    %c0_i32_1 = arith.constant 0 : i32
    return %arg0, %c0_i32, %c0_i32_0 : i32, i32, i32
  }
  func.func @transform_6(%arg0: i32, %arg1: i32, %arg2: i32) -> (i32, i32, i32) {
    %c0_i32 = arith.constant 0 : i32
    %c0_i32_0 = arith.constant 0 : i32
    %c0_i32_1 = arith.constant 0 : i32
    return %arg0, %c0_i32, %c0_i32_0 : i32, i32, i32
  }
  func.func @transform_7(%arg0: i32, %arg1: i32, %arg2: i32) -> (i32, i32, i32) {
    %c0_i32 = arith.constant 0 : i32
    return %arg1, %arg0, %arg2 : i32, i32, i32
  }
}

</mosaic_0001>

<bundles_post_ra>
// kernel: tpu_custom_call.1
= control target key start
LH: loop header
LB: loop body
LE: loop exit
PB: predicated region body
PF: predicated region fallthrough
CT: control target
= control target key end

     0   :  { %v2090_v3 = vmov 0   ;;  %vm335_vm0 = vcmask 130048   ;;  %s3069_s0 = inlined_call_operand.vmem [shape: f32[2,16,128], index: 0, kind: input, shape index: {}]   ;;  %s3070_s1 = inlined_call_operand.vmem [shape: bf16[1,256,16], index: 1, kind: input, shape index: {}]   ;;  %s3071_s2 = inlined_call_operand.vmem [shape: f32[1,256,1], index: 2, kind: input, shape index: {}]   ;;  %s3072_s3 = inlined_call_operand.vmem [shape: bf16[1,128,256], index: 3, kind: input, shape index: {}]   ;;  %s3073_s4 = inlined_call_operand.vmem [shape: f32[1,128,1], index: 4, kind: input, shape index: {}]   ;;  %s3074_s5 = inlined_call_operand.vmem [shape: bf16[1,8,128], index: 5, kind: input, shape index: {}]   ;;  %s3075_s6 = inlined_call_operand.vmem [shape: f32[1,8,1], index: 6, kind: input, shape index: {}]   ;;  %s3076_s7 = inlined_call_operand.hbm [shape: f32[2,8,128], index: 7, kind: output, shape index: {}]  }
   0x1   :  { %v2137_v0 = vld [vmem:[%s3071_s2 + $0xf0] sm:$0xff]  ;;  %v2142_v1 = vld [vmem:[%s3071_s2 + $0xe0] sm:$0xff]  ;;  %2063 = vset.pattern.permute.xlu2 %v2090_v3  ;;  %2062 = vset.pattern.permute.xlu1 %v2090_v3  ;;  %v29_v5 = vld [vmem:[%s3069_s0 + $0x8] sm:$0xff] }
   0x2   :  { %v2147_v2 = vld [vmem:[%s3071_s2 + $0x70] sm:$0xff]  ;;  %v28_v4 = vld [vmem:[%s3069_s0] sm:$0xff]  ;;  %2061 = vset.pattern.permute.xlu0 %v2090_v3  ;;  %237 = vperm.xlu2 %2063, %v2142_v1  }
   0x3   :  { %v94_v6 = vpack.c.bf16 %v29_v5, %v28_v4  ;;  %247 = vperm.xlu0 %2061, %v2137_v0   ;;  %167 = vperm.xlu1 %2062, %v2147_v2   ;;  %v1993_v7 = vld [vmem:[%s3070_s1] sm:$0xff] }
   0x5   :  { %391 = vmatpush.bf16.msra.mxu0 %v94_v6 }
   0x6   :  { %12 = vsyncpa [#allocation3], 0  ;;  %v2165_v8 = vld [vmem:[%s3071_s2 + $0xe8] sm:$0xff]  ;;  %v2170_v9 = vld [vmem:[%s3071_s2 + $0xf8] sm:$0xff]  ;;  %s2091_s19 = smov [#allocation2]   ;;  %s2092_s23 = smov 128  }
   0x7   :  { %v2175_v10 = vld [vmem:[%s3071_s2 + $0x78] sm:$0xff]  ;;  %v2183_v11 = vld [vmem:[%s3071_s2 + $0xd0] sm:$0xff]  ;;  %v2188_v12 = vld [vmem:[%s3071_s2 + $0x68] sm:$0xff]  ;;  %s1689_s20 = sshll.u32 %s2091_s19, 4  ;;  %s2093_s24 = smov 8   ;;  %s1690_s20 = int_to_ptr.vmem [resolvable:$true] %s1689_s20 }
   0x8   :  { %1767 = vmatmul.msk.bf16.vlgmr.msra.gmra.mxu0 %vm335_vm0, %v1993_v7  ;;  %v2193_v13 = vld [vmem:[%s3071_s2 + $0x60] sm:$0xff]  ;;  %v1994_v14 = vld [vmem:[%s3070_s1 + $0x8] sm:$0xff]  ;;  %v2205_v15 = vld [vmem:[%s3071_s2 + $0x58] sm:$0xff] }
   0x9   :  { %v2210_v16 = vld [vmem:[%s3071_s2 + $0xd8] sm:$0xff]  ;;  %v2215_v17 = vld [vmem:[%s3071_s2 + $0x50] sm:$0xff]  ;;  %v2223_v18 = vld [vmem:[%s3071_s2 + $0x40] sm:$0xff] }
   0xa   :  { %242 = vperm.xlu2 %2063, %v2165_v8   ;;  %v2228_v19 = vld [vmem:[%s3071_s2 + $0xc0] sm:$0xff]  ;;  %v2233_v20 = vld [vmem:[%s3071_s2 + $0xc8] sm:$0xff]  ;;  %v1995_v21 = vld [vmem:[%s3070_s1 + $0x10] sm:$0xff] }
   0xb   :  { %252 = vperm.xlu0 %2061, %v2170_v9   ;;  %172 = vperm.xlu1 %2062, %v2175_v10   ;;  %v2245_v22 = vld [vmem:[%s3071_s2 + $0xb8] sm:$0xff]  ;;  %v2250_v23 = vld [vmem:[%s3071_s2 + $0xb0] sm:$0xff]  ;;  %v2255_v24 = vld [vmem:[%s3071_s2 + $0x48] sm:$0xff] }
   0xc   :  { %v2263_v25 = vld [vmem:[%s3071_s2 + $0xa0] sm:$0xff]  ;;  %v2268_v26 = vld [vmem:[%s3071_s2 + $0x38] sm:$0xff]  ;;  %v2273_v27 = vld [vmem:[%s3071_s2 + $0x30] sm:$0xff] }
   0xd   :  { %v1996_v28 = vld [vmem:[%s3070_s1 + $0x18] sm:$0xff]  ;;  %v2285_v29 = vld [vmem:[%s3071_s2 + $0x28] sm:$0xff]  ;;  %v2295_v31 = vld [vmem:[%s3071_s2 + $0x20] sm:$0xff] }
   0xe   :  { %v2290_v30 = vld [vmem:[%s3071_s2 + $0xa8] sm:$0xff]  ;;  %v2303_v32 = vld [vmem:[%s3071_s2 + $0x10] sm:$0xff]  ;;  %v2313_v34 = vld [vmem:[%s3071_s2 + $0x98] sm:$0xff] }
   0xf   :  { %v2308_v33 = vld [vmem:[%s3071_s2 + $0x90] sm:$0xff]  ;;  %v1997_v35 = vld [vmem:[%s3070_s1 + $0x20] sm:$0xff]  ;;  %v2325_v36 = vld [vmem:[%s3071_s2 + $0x88] sm:$0xff] }
  0x10   :  { %v2330_v37 = vld [vmem:[%s3071_s2 + $0x80] sm:$0xff]  ;;  %v2335_v38 = vld [vmem:[%s3071_s2 + $0x18] sm:$0xff]  ;;  %v2343_v39 = vld [vmem:[%s3073_s4 + $0x70] sm:$0xff] }
  0x11   :  { %v2348_v40 = vld [vmem:[%s3071_s2 + $0x8] sm:$0xff]  ;;  %v2353_v41 = vld [vmem:[%s3071_s2] sm:$0xff]  ;;  %v2375_v45 = vld [vmem:[%s3073_s4 + $0x78] sm:$0xff] }
  0x12   :  { %227 = vperm.xlu2 %2063, %v2183_v11   ;;  %v1998_v42 = vld [vmem:[%s3070_s1 + $0x28] sm:$0xff]  ;;  %v2370_v44 = vld [vmem:[%s3073_s4 + $0x60] sm:$0xff]  ;;  %v2388_v47 = vld [vmem:[%s3073_s4 + $0x58] sm:$0xff] }
  0x13   :  { %162 = vperm.xlu1 %2062, %v2188_v12   ;;  %157 = vperm.xlu0 %2061, %v2193_v13   ;;  %v2365_v43 = vld [vmem:[%s3073_s4 + $0x68] sm:$0xff]  ;;  %v2383_v46 = vld [vmem:[%s3073_s4 + $0x40] sm:$0xff]  ;;  %v2393_v48 = vld [vmem:[%s3073_s4 + $0x50] sm:$0xff] }
  0x14   :  { %v1999_v49 = vld [vmem:[%s3070_s1 + $0x30] sm:$0xff]  ;;  %v2407_v51 = vld [vmem:[%s3073_s4 + $0x38] sm:$0xff]  ;;  %v2417_v53 = vld [vmem:[%s3073_s4 + $0x48] sm:$0xff] }
  0x15   :  { %v2412_v52 = vld [vmem:[%s3073_s4 + $0x30] sm:$0xff]  ;;  %v2432_v56 = vld [vmem:[%s3073_s4 + $0x28] sm:$0xff]  ;;  %v2437_v57 = vld [vmem:[%s3073_s4 + $0x20] sm:$0xff] }
  0x16   :  { %v2425_v54 = vld [vmem:[%s3073_s4 + $0x10] sm:$0xff]  ;;  %v2000_v58 = vld [vmem:[%s3070_s1 + $0x38] sm:$0xff]  ;;  %v2453_v61 = vld [vmem:[%s3073_s4 + $0x8] sm:$0xff] }
  0x17   :  { %v2458_v62 = vld [vmem:[%s3073_s4] sm:$0xff]  ;;  %v2463_v63 = vld [vmem:[%s3073_s4 + $0x18] sm:$0xff]  ;;  %s1691_s4 = sshll.u32 %s3076_s7, 4  ;;  %s1692_s4 = int_to_ptr.hbm [resolvable:$true] %s1691_s4 }
  0x18   :  { %1768 = vmatmul.msk.bf16.gmra.mxu0 %vm335_vm0, %v1994_v14  ;;  %v2001_v6 = vld [vmem:[%s3070_s1 + $0x40] sm:$0xff] }
  0x1a   :  { %152 = vperm.xlu2 %2063, %v2205_v15  }
  0x1b   :  { %232 = vperm.xlu0 %2061, %v2210_v16   ;;  %147 = vperm.xlu1 %2062, %v2215_v17  }
  0x22   :  { %137 = vperm.xlu2 %2063, %v2223_v18  }
  0x23   :  { %217 = vperm.xlu0 %2061, %v2228_v19   ;;  %222 = vperm.xlu1 %2062, %v2233_v20  }
  0x28   :  { %1769 = vmatmul.msk.bf16.gmra.mxu0 %vm335_vm0, %v1995_v21 }
  0x2a   :  { %212 = vperm.xlu2 %2063, %v2245_v22  }
  0x2b   :  { %207 = vperm.xlu1 %2062, %v2250_v23   ;;  %142 = vperm.xlu0 %2061, %v2255_v24  }
  0x32   :  { %197 = vperm.xlu2 %2063, %v2263_v25  }
  0x33   :  { %132 = vperm.xlu1 %2062, %v2268_v26   ;;  %127 = vperm.xlu0 %2061, %v2273_v27  }
  0x38   :  { %1770 = vmatmul.msk.bf16.gmra.mxu0 %vm335_vm0, %v1996_v28 }
  0x3a   :  { %122 = vperm.xlu2 %2063, %v2285_v29  }
  0x3b   :  { %202 = vperm.xlu0 %2061, %v2290_v30   ;;  %117 = vperm.xlu1 %2062, %v2295_v31  }
  0x42   :  { %107 = vperm.xlu2 %2063, %v2303_v32  }
  0x43   :  { %187 = vperm.xlu0 %2061, %v2308_v33   ;;  %192 = vperm.xlu1 %2062, %v2313_v34  }
  0x48   :  { %1771 = vmatmul.msk.bf16.gmra.mxu0 %vm335_vm0, %v1997_v35 }
  0x4a   :  { %182 = vperm.xlu2 %2063, %v2325_v36  }
  0x4b   :  { %177 = vperm.xlu1 %2062, %v2330_v37   ;;  %112 = vperm.xlu0 %2061, %v2335_v38  }
  0x52   :  { %625 = vperm.xlu2 %2063, %v2343_v39  }
  0x53   :  { %102 = vperm.xlu1 %2062, %v2348_v40   ;;  %97 = vperm.xlu0 %2061, %v2353_v41  }
  0x58   :  { %1772 = vmatmul.msk.bf16.gmra.mxu0 %vm335_vm0, %v1998_v42 }
  0x5a   :  { %620 = vperm.xlu2 %2063, %v2365_v43  }
  0x5b   :  { %615 = vperm.xlu1 %2062, %v2370_v44   ;;  %630 = vperm.xlu0 %2061, %v2375_v45  }
  0x5c   :  { %v2401_v50 = vpop.permute.xlu2 %237 }
  0x5d   :  { %3077 = vst [vmem:[#allocation5_spill] sm:$0xff] %v2401_v50 }
  0x62   :  { %595 = vperm.xlu2 %2063, %v2383_v46  }
  0x63   :  { %610 = vperm.xlu1 %2062, %v2388_v47   ;;  %605 = vperm.xlu0 %2061, %v2393_v48  }
  0x64   :  { %v2427_v55 = vpop.permute.xlu2 %242 }
  0x68   :  { %1773 = vmatmul.msk.bf16.gmra.mxu0 %vm335_vm0, %v1999_v49 }
  0x6a   :  { %590 = vperm.xlu2 %2063, %v2407_v51  }
  0x6b   :  { %585 = vperm.xlu1 %2062, %v2412_v52   ;;  %600 = vperm.xlu0 %2061, %v2417_v53  }
  0x6c   :  { %v2465_v3 = vpop.permute.xlu2 %227 }
  0x6d   :  { %3078 = vst [vmem:[#allocation6_spill] sm:$0xff] %v2465_v3 }
  0x72   :  { %565 = vperm.xlu2 %2063, %v2425_v54  }
  0x73   :  { %580 = vperm.xlu1 %2062, %v2432_v56   ;;  %575 = vperm.xlu0 %2061, %v2437_v57  }
  0x74   :  { %v2480_v7 = vpop.permute.xlu2 %152 }
  0x75   :  { %v2445_v59 = vpop.permute.xlu0 %247  ;;  %v2447_v60 = vpop.permute.xlu1 %167 }
  0x78   :  { %1774 = vmatmul.msk.bf16.gmra.mxu0 %vm335_vm0, %v2000_v58 }
  0x7a   :  { %560 = vperm.xlu2 %2063, %v2453_v61  }
  0x7b   :  { %555 = vperm.xlu1 %2062, %v2458_v62   ;;  %570 = vperm.xlu0 %2061, %v2463_v63  }
  0x7c   :  { %v2498_v35 = vpop.permute.xlu2 %137 }
  0x7d   :  { %v2470_v4 = vpop.permute.xlu0 %252  ;;  %v2472_v5 = vpop.permute.xlu1 %172 }
  0x7e   :  { %3079 = vst [vmem:[#allocation7_spill] sm:$0xff] %v2470_v4 }
  0x82   :  { %996 = vperm.xlu2 %2063, %v2147_v2  }
  0x83   :  { %1081 = vperm.xlu1 %2062, %v2170_v9   ;;  %1076 = vperm.xlu0 %2061, %v2137_v0  }
  0x84   :  { %v2511_v49 = vpop.permute.xlu2 %212 }
  0x85   :  { %v2482_v14 = vpop.f32.mrf.mxu0  ;;  %v2484_v21 = vpop.permute.xlu1 %162 }
  0x86   :  { %v2486_v28 = vpop.permute.xlu0 %157 }
  0x88   :  { %1775 = vmatmul.msk.bf16.gmra.mxu0 %vm335_vm0, %v2001_v6 }
  0x8a   :  { %1071 = vperm.xlu2 %2063, %v2165_v8  }
  0x8b   :  { %1066 = vperm.xlu1 %2062, %v2142_v1   ;;  %1001 = vperm.xlu0 %2061, %v2175_v10   ;;  %v2002_v1 = vld [vmem:[%s3070_s1 + $0x48] sm:$0xff] }
  0x8c   :  { %v2520_v58 = vpop.permute.xlu2 %197 }
  0x8d   :  { %v2492_v0 = vpop.f32.mrf.mxu0  ;;  %v2496_v9 = vpop.permute.xlu1 %147 }
  0x8e   :  { %v2494_v2 = vpop.permute.xlu0 %232 }
  0x8f   :  { %3080 = vst [vmem:[#allocation8_spill] sm:$0xff] %v2494_v2 }
  0x92   :  { %1056 = vperm.xlu2 %2063, %v2183_v11  }
  0x93   :  { %991 = vperm.xlu1 %2062, %v2188_v12   ;;  %986 = vperm.xlu0 %2061, %v2193_v13  }
  0x95   :  { %v398_v8 = vpop.f32.mrf.mxu0  ;;  %v2508_v42 = vpop.permute.xlu1 %222 }
  0x96   :  { %v2506_v10 = vpop.permute.xlu0 %217  ;;  %3082 = vst [vmem:[#allocation10_spill] sm:$0xff] %v2508_v42 }
  0x97   :  { %3081 = vst [vmem:[#allocation9_spill] sm:$0xff] %v2506_v10 }
  0x98   :  { %1776 = vmatmul.msk.bf16.gmra.mxu0 %vm335_vm0, %v2002_v1 }
  0x9a   :  { %981 = vperm.xlu2 %2063, %v2205_v15   ;;  %v2003_v15 = vld [vmem:[%s3070_s1 + $0x50] sm:$0xff] }
  0x9b   :  { %976 = vperm.xlu1 %2062, %v2215_v17   ;;  %1061 = vperm.xlu0 %2061, %v2210_v16  }
  0x9d   :  { %v400_v11 = vpop.f32.mrf.mxu0  ;;  %v2516_v12 = vpop.permute.xlu1 %207 }
  0x9e   :  { %v2518_v13 = vpop.permute.xlu0 %142 }
  0xa2   :  { %966 = vperm.xlu2 %2063, %v2223_v18   ;;  %v123_v18 = vpop.permute.xlu2 %122 }
  0xa3   :  { %1051 = vperm.xlu1 %2062, %v2233_v20   ;;  %1046 = vperm.xlu0 %2061, %v2228_v19  }
  0xa5   :  { %v403_v17 = vpop.f32.mrf.mxu0  ;;  %v133_v6 = vpop.permute.xlu1 %132 }
  0xa6   :  { %v128_v16 = vpop.permute.xlu0 %127 }
  0xa8   :  { %1777 = vmatmul.msk.bf16.gmra.mxu0 %vm335_vm0, %v2003_v15 }
  0xaa   :  { %1041 = vperm.xlu2 %2063, %v2245_v22   ;;  %v2004_v22 = vld [vmem:[%s3070_s1 + $0x58] sm:$0xff] }
  0xab   :  { %1036 = vperm.xlu1 %2062, %v2250_v23   ;;  %971 = vperm.xlu0 %2061, %v2255_v24  }
  0xad   :  { %v405_v1 = vpop.f32.mrf.mxu0  ;;  %v118_v19 = vpop.permute.xlu1 %117 }
  0xae   :  { %v406_v20 = vadd.f32 %v405_v1, %v123_v18  ;;  %v2532_v10 = vpop.permute.xlu0 %202  ;;  %v404_v42 = vadd.f32 %v403_v17, %v118_v19 }
  0xb0   :  { %v478_v3 = vmax.f32 %v406_v20, 0.0  ;;  %v477_v2 = vmax.f32 %v404_v42, 0.0  ;;  %v108_v42 = vpop.permute.xlu2 %107 }
  0xb2   :  { %1026 = vperm.xlu2 %2063, %v2263_v25   ;;  %v2535_v50 = vpack.c.bf16 %v478_v3, %v477_v2 }
  0xb3   :  { %961 = vperm.xlu1 %2062, %v2268_v26   ;;  %956 = vperm.xlu0 %2061, %v2273_v27   ;;  %v399_v26 = vadd.f32 %v398_v8, %v108_v42 }
  0xb5   :  { %v408_v23 = vpop.f32.mrf.mxu0  ;;  %v2544_v15 = vpop.permute.xlu1 %192  ;;  %v475_v19 = vmax.f32 %v399_v26, 0.0 }
  0xb6   :  { %v2542_v24 = vpop.permute.xlu0 %187  ;;  %v409_v25 = vadd.f32 %v408_v23, %v128_v16 }
  0xb8   :  { %1778 = vmatmul.msk.bf16.gmra.mxu0 %vm335_vm0, %v2004_v22  ;;  %v479_v1 = vmax.f32 %v409_v25, 0.0  ;;  %v183_v25 = vpop.permute.xlu2 %182 }
  0xba   :  { %951 = vperm.xlu2 %2063, %v2285_v29  }
  0xbb   :  { %946 = vperm.xlu1 %2062, %v2295_v31   ;;  %1031 = vperm.xlu0 %2061, %v2290_v30   ;;  %v2005_v30 = vld [vmem:[%s3070_s1 + $0x60] sm:$0xff] }
  0xbd   :  { %v410_v27 = vpop.f32.mrf.mxu0  ;;  %v2550_v2 = vpop.permute.xlu1 %177 }
  0xbe   :  { %v411_v3 = vadd.f32 %v410_v27, %v133_v6  ;;  %v113_v17 = vpop.permute.xlu0 %112 }
  0xbf   :  { %v401_v18 = vadd.f32 %v400_v11, %v113_v17 }
  0xc0   :  { %v480_v20 = vmax.f32 %v411_v3, 0.0 }
  0xc1   :  { %v476_v4 = vmax.f32 %v401_v18, 0.0 }
  0xc2   :  { %v2552_v22 = vpack.c.bf16 %v480_v20, %v479_v1  ;;  %936 = vperm.xlu2 %2063, %v2303_v32   ;;  %v1785_v20 = vld [vmem:[%s3072_s3] sm:$0xf] }
  0xc3   :  { %v2555_v29 = vpack.c.bf16 %v476_v4, %v475_v19  ;;  %1021 = vperm.xlu1 %2062, %v2313_v34   ;;  %1016 = vperm.xlu0 %2061, %v2308_v33   ;;  %v2010_v19 = vld [vmem:[%s3072_s3 + $0x4] sm:$0xf0] }
  0xc5   :  { %v2562_v31 = vpop.f32.mrf.mxu0  ;;  %v103_v8 = vpop.permute.xlu1 %102 }
  0xc6   :  { %v98_v11 = vpop.permute.xlu0 %97  ;;  %v396_v6 = vadd.f32 %v2492_v0, %v103_v8  ;;  %v1786_v8 = vor.u32 %v2010_v19, %v1785_v20  ;;  %v3087_v20 = vld [vmem:[#allocation10_spill] sm:$0xff] }
  0xc7   :  { %v394_v16 = vadd.f32 %v2482_v14, %v98_v11  ;;  %v2006_v14 = vld [vmem:[%s3070_s1 + $0x68] sm:$0xff] }
  0xc8   :  { %1779 = vmatmul.msk.bf16.gmra.mxu0 %vm335_vm0, %v2005_v30  ;;  %v474_v32 = vmax.f32 %v396_v6, 0.0  ;;  %v1793_v6 = vld [vmem:[%s3072_s3 + $0x10] sm:$0xf] }
  0xc9   :  { %v473_v4 = vmax.f32 %v394_v16, 0.0 }
  0xca   :  { %1011 = vperm.xlu2 %2063, %v2325_v36  }
  0xcb   :  { %v2568_v34 = vpack.c.bf16 %v474_v32, %v473_v4  ;;  %1006 = vperm.xlu1 %2062, %v2330_v37   ;;  %941 = vperm.xlu0 %2061, %v2335_v38   ;;  %v2007_v37 = vld [vmem:[%s3070_s1 + $0x70] sm:$0xff] }
  0xcd   :  { %v415_v33 = vpop.f32.mrf.mxu0 }
  0xd2   :  { %1453 = vperm.xlu2 %2063, %v2343_v39  }
  0xd3   :  { %931 = vperm.xlu1 %2062, %v2348_v40   ;;  %926 = vperm.xlu0 %2061, %v2353_v41   ;;  %v2008_v40 = vld [vmem:[%s3070_s1 + $0x78] sm:$0xff] }
  0xd5   :  { %v418_v0 = vpop.f32.mrf.mxu0 }
  0xd8   :  { %1780 = vmatmul.msk.bf16.gmra.mxu0 %vm335_vm0, %v2006_v14 }
  0xda   :  { %1448 = vperm.xlu2 %2063, %v2365_v43  }
  0xdb   :  { %1443 = vperm.xlu1 %2062, %v2370_v44   ;;  %1458 = vperm.xlu0 %2061, %v2375_v45  }
  0xdd   :  { %v420_v36 = vpop.f32.mrf.mxu0 }
  0xe2   :  { %1423 = vperm.xlu2 %2063, %v2383_v46  }
  0xe3   :  { %1438 = vperm.xlu1 %2062, %v2388_v47   ;;  %1433 = vperm.xlu0 %2061, %v2393_v48  }
  0xe5   :  { %v423_v38 = vpop.f32.mrf.mxu0 }
  0xe8   :  { %1781 = vmatmul.msk.bf16.gmra.mxu0 %vm335_vm0, %v2007_v37  ;;  %v2014_v37 = vld [vmem:[%s3072_s3 + $0x24] sm:$0xf0] }
  0xea   :  { %1418 = vperm.xlu2 %2063, %v2407_v51   ;;  %v424_v51 = vadd.f32 %v423_v38, %v2486_v28  ;;  %v414_v28 = vadd.f32 %v2562_v31, %v2498_v35 }
  0xeb   :  { %1413 = vperm.xlu1 %2062, %v2412_v52   ;;  %1428 = vperm.xlu0 %2061, %v2417_v53   ;;  %v1656_v52 = vld [vmem:[%s3075_s6] sm:$0xff] }
  0xec   :  { %v481_v26 = vmax.f32 %v414_v28, 0.0 }
  0xed   :  { %v425_v39 = vpop.f32.mrf.mxu0 }
  0xee   :  { %v426_v46 = vadd.f32 %v425_v39, %v2484_v21 }
  0xf2   :  { %1393 = vperm.xlu2 %2063, %v2425_v54   ;;  %v421_v54 = vadd.f32 %v420_v36, %v2480_v7  ;;  %v1801_v36 = vld [vmem:[%s3072_s3 + $0x20] sm:$0xf] }
  0xf3   :  { %1408 = vperm.xlu1 %2062, %v2432_v56   ;;  %1403 = vperm.xlu0 %2061, %v2437_v57   ;;  %v486_v56 = vmax.f32 %v426_v46, 0.0  ;;  %v419_v57 = vadd.f32 %v418_v0, %v2496_v9 }
  0xf5   :  { %v428_v41 = vpop.f32.mrf.mxu0  ;;  %v483_v23 = vmax.f32 %v419_v57, 0.0  ;;  %v2020_v57 = vld [vmem:[%s3072_s3 + $0x54] sm:$0xf0] }
  0xf6   :  { %v429_v43 = vadd.f32 %v428_v41, %v2447_v60  ;;  %v485_v60 = vmax.f32 %v424_v51, 0.0  ;;  %v2018_v51 = vld [vmem:[%s3072_s3 + $0x44] sm:$0xf0] }
  0xf8   :  { %1782 = vmatmul.msk.bf16.gmra.mxu0 %vm335_vm0, %v2008_v40  ;;  %v487_v47 = vmax.f32 %v429_v43, 0.0  ;;  %v543_v21 = vpack.c.bf16 %v486_v56, %v485_v60  ;;  %v1802_v40 = vor.u32 %v2014_v37, %v1801_v36  ;;  %v1825_v56 = vld [vmem:[%s3072_s3 + $0x50] sm:$0xf]  ;;  %v1803_v36 = vld [vmem:[%s3072_s3 + $0x28] sm:$0xf0] }
  0xf9   :  { %v1826_v60 = vor.u32 %v2020_v57, %v1825_v56  ;;  %v2015_v37 = vld [vmem:[%s3072_s3 + $0x34] sm:$0xf] }
  0xfa   :  { %1388 = vperm.xlu2 %2063, %v2453_v61  }
  0xfb   :  { %1383 = vperm.xlu1 %2062, %v2458_v62   ;;  %1398 = vperm.xlu0 %2061, %v2463_v63   ;;  %v416_v63 = vadd.f32 %v415_v33, %v2518_v13 }
  0xfd   :  { %v430_v44 = vpop.f32.mrf.mxu0  ;;  %v482_v7 = vmax.f32 %v416_v63, 0.0 }
  0xfe   :  { %v431_v45 = vadd.f32 %v430_v44, %v2472_v5  ;;  %v484_v5 = vmax.f32 %v421_v54, 0.0 }
  0xff   :  { %v541_v3 = vpack.c.bf16 %v482_v7, %v481_v26 }
 0x100   :  { %v488_v48 = vmax.f32 %v431_v45, 0.0  ;;  %v542_v42 = vpack.c.bf16 %v484_v5, %v483_v23  ;;  %v2016_v45 = vld [vmem:[%s3072_s3 + $0x34] sm:$0xf0]  ;;  %v1833_v5 = vld [vmem:[%s3072_s3 + $0x60] sm:$0xf] }
 0x101   :  { %v3083_v23 = vld [vmem:[#allocation7_spill] sm:$0xff] }
 0x102   :  { %v544_v53 = vpack.c.bf16 %v488_v48, %v487_v47 }
 0x103   :  { %1667 = vperm.xlu1 %2062, %v1656_v52   ;;  %839 = vperm.xlu0 %2061, %v1656_v52  }
 0x104   :  { %713 = vmatpush.bf16.msra.mxu1 %v544_v53 }
 0x105   :  { %v433_v61 = vpop.f32.mrf.mxu0 }
 0x106   :  { %v434_v62 = vadd.f32 %v433_v61, %v2550_v2 }
 0x108   :  { %714 = vmatpush.bf16.msra.mxu1 %v543_v21  ;;  %v489_v17 = vmax.f32 %v434_v62, 0.0  ;;  %v2022_v21 = vld [vmem:[%s3072_s3 + $0x64] sm:$0xf0] }
 0x10c   :  { %715 = vmatpush.bf16.msra.mxu1 %v542_v42  ;;  %v3084_v42 = vld [vmem:[#allocation5_spill] sm:$0xff] }
 0x10d   :  { %v435_v9 = vpop.f32.mrf.mxu0 }
 0x10e   :  { %v436_v27 = vadd.f32 %v435_v9, %v183_v25 }
 0x110   :  { %v490_v18 = vmax.f32 %v436_v27, 0.0  ;;  %716 = vmatpush.bf16.msra.mxu1 %v541_v3  ;;  %v1834_v27 = vor.u32 %v2022_v21, %v1833_v5  ;;  %v3085_v3 = vld [vmem:[#allocation8_spill] sm:$0xff] }
 0x112   :  { %v2615_v2 = vpack.c.bf16 %v490_v18, %v489_v17 }
 0x114   :  { %717 = vmatpush.bf16.msra.mxu1 %v2552_v22 }
 0x115   :  { %v438_v13 = vpop.f32.mrf.mxu0 }
 0x116   :  { %v439_v35 = vadd.f32 %v438_v13, %v2542_v24  ;;  %v3086_v13 = vld [vmem:[#allocation6_spill] sm:$0xff] }
 0x118   :  { %718 = vmatpush.bf16.msra.mxu1 %v2535_v50  ;;  %v491_v31 = vmax.f32 %v439_v35, 0.0 }
 0x11c   :  { %719 = vmatpush.bf16.msra.mxu1 %v2555_v29 }
 0x11d   :  { %v440_v1 = vpop.f32.mrf.mxu0 }
 0x11e   :  { %v441_v30 = vadd.f32 %v440_v1, %v2544_v15  ;;  %v2012_v15 = vld [vmem:[%s3072_s3 + $0x14] sm:$0xf0] }
 0x120   :  { %v492_v22 = vmax.f32 %v441_v30, 0.0  ;;  %720 = vmatpush.bf16.msra.mxu1 %v2568_v34  ;;  %v1794_v34 = vor.u32 %v2012_v15, %v1793_v6  ;;  %v1841_v6 = vld [vmem:[%s3072_s3 + $0x70] sm:$0xf]  ;;  %v2024_v15 = vld [vmem:[%s3072_s3 + $0x74] sm:$0xf0] }
 0x122   :  { %v2629_v50 = vpack.c.bf16 %v492_v22, %v491_v31  ;;  %v3088_v31 = vld [vmem:[#allocation9_spill] sm:$0xff] }
 0x123   :  { %721 = vmatmul.bf16.vlgmr.msra.gmra.mxu1 %v1786_v8 }
 0x125   :  { %v443_v24 = vpop.f32.mrf.mxu0 }
 0x126   :  { %v444_v29 = vadd.f32 %v443_v24, %v2520_v58 }
 0x128   :  { %v493_v32 = vmax.f32 %v444_v29, 0.0 }
 0x12d   :  { %v445_v11 = vpop.f32.mrf.mxu0 }
 0x12e   :  { %v446_v16 = vadd.f32 %v445_v11, %v2532_v10 }
 0x130   :  { %v494_v4 = vmax.f32 %v446_v16, 0.0 }
 0x132   :  { %v2639_v33 = vpack.c.bf16 %v494_v4, %v493_v32  ;;  %v1842_v32 = vor.u32 %v2024_v15, %v1841_v6  ;;  %v2009_v4 = vld [vmem:[%s3072_s3 + $0x4] sm:$0xf] }
 0x133   :  { %726 = vmatmul.bf16.gmra.mxu1 %v1794_v34  ;;  %v1787_v34 = vld [vmem:[%s3072_s3 + $0x8] sm:$0xf0] }
 0x135   :  { %v448_v14 = vpop.f32.mrf.mxu0 }
 0x136   :  { %v449_v58 = vadd.f32 %v448_v14, %v2516_v12  ;;  %v1809_v12 = vld [vmem:[%s3072_s3 + $0x30] sm:$0xf]  ;;  %v1790_v14 = vor.u32 %v2009_v4, %v1787_v34 }
 0x137   :  { %v1810_v46 = vor.u32 %v2016_v45, %v1809_v12  ;;  %v2726_v45 = vpop.permute.xlu1 %615 }
 0x138   :  { %v495_v38 = vmax.f32 %v449_v58, 0.0  ;;  %v2011_v58 = vld [vmem:[%s3072_s3 + $0x14] sm:$0xf] }
 0x13d   :  { %v450_v0 = vpop.f32.mrf.mxu0 }
 0x13e   :  { %v451_v10 = vadd.f32 %v450_v0, %v2511_v49  ;;  %v1817_v49 = vld [vmem:[%s3072_s3 + $0x40] sm:$0xf]  ;;  %v2013_v0 = vld [vmem:[%s3072_s3 + $0x24] sm:$0xf] }
 0x13f   :  { %v1818_v52 = vor.u32 %v2018_v51, %v1817_v49  ;;  %v2734_v51 = vpop.permute.xlu1 %610 }
 0x140   :  { %v496_v39 = vmax.f32 %v451_v10, 0.0  ;;  %v1811_v10 = vld [vmem:[%s3072_s3 + $0x38] sm:$0xf0] }
 0x142   :  { %v548_v41 = vpack.c.bf16 %v496_v39, %v495_v38  ;;  %v1814_v38 = vor.u32 %v2015_v37, %v1811_v10  ;;  %v2017_v39 = vld [vmem:[%s3072_s3 + $0x44] sm:$0xf] }
 0x143   :  { %731 = vmatmul.bf16.gmra.mxu1 %v1802_v40  ;;  %v1819_v40 = vld [vmem:[%s3072_s3 + $0x48] sm:$0xf0] }
 0x145   :  { %v453_v43 = vpop.f32.mrf.mxu0 }
 0x146   :  { %v454_v22 = vadd.f32 %v453_v43, %v3088_v31  ;;  %v2019_v43 = vld [vmem:[%s3072_s3 + $0x54] sm:$0xf] }
 0x148   :  { %v497_v11 = vmax.f32 %v454_v22, 0.0 }
 0x14d   :  { %v455_v44 = vpop.f32.mrf.mxu0 }
 0x14e   :  { %v456_v19 = vadd.f32 %v455_v44, %v3087_v20  ;;  %v1827_v44 = vld [vmem:[%s3072_s3 + $0x58] sm:$0xf0] }
 0x14f   :  { %v1830_v12 = vor.u32 %v2019_v43, %v1827_v44 }
 0x150   :  { %v498_v24 = vmax.f32 %v456_v19, 0.0 }
 0x152   :  { %v549_v16 = vpack.c.bf16 %v498_v24, %v497_v11 }
 0x153   :  { %736 = vmatmul.bf16.gmra.mxu1 %v1810_v46  ;;  %v2021_v46 = vld [vmem:[%s3072_s3 + $0x64] sm:$0xf] }
 0x155   :  { %v458_v47 = vpop.f32.mrf.mxu0 }
 0x156   :  { %v459_v35 = vadd.f32 %v458_v47, %v3086_v13  ;;  %v1835_v47 = vld [vmem:[%s3072_s3 + $0x68] sm:$0xf0] }
 0x158   :  { %v499_v8 = vmax.f32 %v459_v35, 0.0 }
 0x15d   :  { %v460_v48 = vpop.f32.mrf.mxu0 }
 0x163   :  { %741 = vmatmul.bf16.gmra.mxu1 %v1818_v52  ;;  %v626_v52 = vpop.permute.xlu2 %625 }
 0x165   :  { %v463_v53 = vpop.f32.mrf.mxu0 }
 0x166   :  { %v464_v25 = vadd.f32 %v463_v53, %v3084_v42  ;;  %v2023_v53 = vld [vmem:[%s3072_s3 + $0x74] sm:$0xf] }
 0x168   :  { %v501_v1 = vmax.f32 %v464_v25, 0.0 }
 0x16d   :  { %v465_v54 = vpop.f32.mrf.mxu0 }
 0x16e   :  { %v466_v28 = vadd.f32 %v465_v54, %v2427_v55  ;;  %v1843_v54 = vld [vmem:[%s3072_s3 + $0x78] sm:$0xf0] }
 0x16f   :  { %v1846_v57 = vor.u32 %v2023_v53, %v1843_v54 }
 0x170   :  { %v502_v17 = vmax.f32 %v466_v28, 0.0 }
 0x172   :  { %v551_v55 = vpack.c.bf16 %v502_v17, %v501_v1 }
 0x173   :  { %746 = vmatmul.bf16.gmra.mxu1 %v1826_v60  ;;  %v586_v60 = vpop.permute.xlu1 %585 }
 0x175   :  { %v468_v61 = vpop.f32.mrf.mxu0 }
 0x176   :  { %v469_v62 = vadd.f32 %v468_v61, %v2445_v59  ;;  %v461_v59 = vadd.f32 %v460_v48, %v3085_v3  ;;  %v1838_v48 = vor.u32 %v2021_v46, %v1835_v47  ;;  %v621_v61 = vpop.permute.xlu2 %620 }
 0x178   :  { %v503_v26 = vmax.f32 %v469_v62, 0.0  ;;  %v500_v30 = vmax.f32 %v461_v59, 0.0 }
 0x17a   :  { %v550_v29 = vpack.c.bf16 %v500_v30, %v499_v8 }
 0x17d   :  { %v470_v63 = vpop.f32.mrf.mxu0 }
 0x17e   :  { %v471_v7 = vadd.f32 %v470_v63, %v3083_v23  ;;  %v2744_v63 = vpop.permute.xlu1 %580  ;;  %v596_v5 = vpop.permute.xlu2 %595 }
 0x180   :  { %v504_v9 = vmax.f32 %v471_v7, 0.0  ;;  %v631_v7 = vpop.permute.xlu0 %630 }
 0x182   :  { %v552_v18 = vpack.c.bf16 %v504_v9, %v503_v26 }
 0x183   :  { %751 = vmatmul.bf16.gmra.mxu1 %v1834_v27 }
 0x184   :  { %762 = vmatpush.bf16.msra.mxu2 %v552_v18 }
 0x186   :  { %v556_v28 = vpop.permute.xlu1 %555  ;;  %v2750_v26 = vpop.permute.xlu2 %590 }
 0x188   :  { %763 = vmatpush.bf16.msra.mxu2 %v551_v55  ;;  %v606_v3 = vpop.permute.xlu0 %605 }
 0x18c   :  { %764 = vmatpush.bf16.msra.mxu2 %v550_v29 }
 0x18e   :  { %v566_v59 = vpop.permute.xlu2 %565 }
 0x190   :  { %765 = vmatpush.bf16.msra.mxu2 %v549_v16  ;;  %v601_v1 = vpop.permute.xlu0 %600 }
 0x193   :  { %756 = vmatmul.bf16.gmra.mxu1 %v1842_v32 }
 0x194   :  { %766 = vmatpush.bf16.msra.mxu2 %v548_v41  ;;  %v1822_v41 = vor.u32 %v2017_v39, %v1819_v40 }
 0x198   :  { %767 = vmatpush.bf16.msra.mxu2 %v2639_v33  ;;  %v576_v30 = vpop.permute.xlu0 %575 }
 0x19c   :  { %768 = vmatpush.bf16.msra.mxu2 %v2629_v50  ;;  %v1795_v50 = vld [vmem:[%s3072_s3 + $0x18] sm:$0xf0] }
 0x19d   :  { %v1798_v33 = vor.u32 %v2011_v58, %v1795_v50 }
 0x1a0   :  { %769 = vmatpush.bf16.msra.mxu2 %v2615_v2  ;;  %v1806_v2 = vor.u32 %v2013_v0, %v1803_v36  ;;  %v722_v49 = vpop.f32.mrf.mxu1  ;;  %v571_v44 = vpop.permute.xlu0 %570 }
 0x1a1   :  { %v723_v23 = vadd.f32 %v722_v49, %v556_v28 }
 0x1a3   :  { %770 = vmatmul.bf16.vlgmr.msra.gmra.mxu2 %v1790_v14 }
 0x1a8   :  { %v2742_v56 = vpop.f32.mrf.mxu1 }
 0x1b0   :  { %v727_v62 = vpop.f32.mrf.mxu1 }
 0x1b1   :  { %v728_v17 = vadd.f32 %v727_v62, %v566_v59 }
 0x1b3   :  { %775 = vmatmul.bf16.gmra.mxu2 %v1798_v33 }
 0x1b8   :  { %v2746_v21 = vpop.f32.mrf.mxu1 }
 0x1c0   :  { %v732_v9 = vpop.f32.mrf.mxu1 }
 0x1c1   :  { %v733_v55 = vadd.f32 %v732_v9, %v576_v30 }
 0x1c3   :  { %780 = vmatmul.bf16.gmra.mxu2 %v1806_v2 }
 0x1c8   :  { %v2754_v18 = vpop.f32.mrf.mxu1 }
 0x1d0   :  { %v737_v19 = vpop.f32.mrf.mxu1 }
 0x1d1   :  { %v738_v11 = vadd.f32 %v737_v19, %v586_v60 }
 0x1d3   :  { %785 = vmatmul.bf16.gmra.mxu2 %v1814_v38 }
 0x1d8   :  { %v739_v8 = vpop.f32.mrf.mxu1 }
 0x1d9   :  { %v740_v19 = vadd.f32 %v739_v8, %v2750_v26 }
 0x1e0   :  { %v742_v29 = vpop.f32.mrf.mxu1 }
 0x1e1   :  { %v743_v4 = vadd.f32 %v742_v29, %v596_v5 }
 0x1e3   :  { %790 = vmatmul.bf16.gmra.mxu2 %v1822_v41 }
 0x1e8   :  { %v744_v16 = vpop.f32.mrf.mxu1 }
 0x1e9   :  { %v745_v59 = vadd.f32 %v744_v16, %v601_v1 }
 0x1f0   :  { %v747_v58 = vpop.f32.mrf.mxu1 }
 0x1f1   :  { %v748_v28 = vadd.f32 %v747_v58, %v606_v3  ;;  %v735_v3 = vadd.f32 %v2754_v18, %v2744_v63  ;;  %v561_v58 = vpop.permute.xlu2 %560 }
 0x1f3   :  { %795 = vmatmul.bf16.gmra.mxu2 %v1830_v12 }
 0x1f8   :  { %v749_v33 = vpop.f32.mrf.mxu1 }
 0x200   :  { %v752_v36 = vpop.f32.mrf.mxu1 }
 0x201   :  { %v753_v49 = vadd.f32 %v752_v36, %v2726_v45 }
 0x203   :  { %800 = vmatmul.bf16.gmra.mxu2 %v1838_v48 }
 0x208   :  { %v754_v37 = vpop.f32.mrf.mxu1 }
 0x209   :  { %v755_v12 = vadd.f32 %v754_v37, %v621_v61  ;;  %v2764_v61 = vpop.permute.xlu0 %1076 }
 0x210   :  { %v757_v39 = vpop.f32.mrf.mxu1 }
 0x211   :  { %v758_v43 = vadd.f32 %v757_v39, %v626_v52  ;;  %v2769_v16 = vpop.permute.xlu0 %1001 }
 0x213   :  { %805 = vmatmul.bf16.gmra.mxu2 %v1846_v57  ;;  %v750_v57 = vadd.f32 %v749_v33, %v2734_v51 }
 0x218   :  { %v759_v41 = vpop.f32.mrf.mxu1 }
 0x219   :  { %v760_v46 = vadd.f32 %v759_v41, %v631_v7  ;;  %v2027_v41 = vld [vmem:[%s3070_s1 + $0x10] sm:$0xff] }
 0x226   :  { %v771_v42 = vpop.f32.mrf.mxu2 }
 0x227   :  { %v2748_v25 = vadd.f32 %v771_v42, %v723_v23 }
 0x22e   :  { %v2752_v27 = vpop.f32.mrf.mxu2 }
 0x236   :  { %v776_v13 = vpop.f32.mrf.mxu2 }
 0x237   :  { %v2756_v35 = vadd.f32 %v776_v13, %v728_v17 }
 0x239   :  { %v813_v33 = vmax.f32 %v2756_v35, 0.0  ;;  %v827_v35 = vld [vmem:[%s3074_s5] sm:$0xf] }
 0x23e   :  { %v2758_v20 = vpop.f32.mrf.mxu2 }
 0x246   :  { %v781_v31 = vpop.f32.mrf.mxu2 }
 0x247   :  { %v2760_v22 = vadd.f32 %v781_v31, %v733_v55 }
 0x249   :  { %v815_v63 = vmax.f32 %v2760_v22, 0.0  ;;  %v811_v22 = vmax.f32 %v2748_v25, 0.0 }
 0x24e   :  { %v783_v24 = vpop.f32.mrf.mxu2 }
 0x24f   :  { %v784_v1 = vadd.f32 %v783_v24, %v735_v3 }
 0x251   :  { %v816_v8 = vmax.f32 %v784_v1, 0.0 }
 0x256   :  { %v786_v6 = vpop.f32.mrf.mxu2 }
 0x257   :  { %v787_v15 = vadd.f32 %v786_v6, %v738_v11 }
 0x25e   :  { %v788_v32 = vpop.f32.mrf.mxu2 }
 0x25f   :  { %v789_v51 = vadd.f32 %v788_v32, %v740_v19  ;;  %v2032_v19 = vld [vmem:[%s3070_s1 + $0x38] sm:$0xff] }
 0x261   :  { %v818_v11 = vmax.f32 %v789_v51, 0.0 }
 0x266   :  { %v791_v34 = vpop.f32.mrf.mxu2 }
 0x267   :  { %v792_v14 = vadd.f32 %v791_v34, %v743_v4  ;;  %v730_v4 = vadd.f32 %v2746_v21, %v571_v44  ;;  %v817_v34 = vmax.f32 %v787_v15, 0.0  ;;  %v2777_v21 = vpop.permute.xlu0 %986  ;;  %v2813_v44 = vpop.permute.xlu1 %1081 }
 0x269   :  { %v819_v29 = vmax.f32 %v792_v14, 0.0  ;;  %v779_v26 = vadd.f32 %v2758_v20, %v730_v4  ;;  %v832_v32 = vpack.c.bf16 %v818_v11, %v817_v34  ;;  %v831_v14 = vpack.c.bf16 %v816_v8, %v815_v63  ;;  %v1847_v20 = vld [vmem:[%s3069_s0 + $0x10] sm:$0xff]  ;;  %v2034_v63 = vld [vmem:[%s3070_s1 + $0x48] sm:$0xff] }
 0x26b   :  { %v814_v24 = vmax.f32 %v779_v26, 0.0 }
 0x26e   :  { %v793_v50 = vpop.f32.mrf.mxu2 }
 0x26f   :  { %v794_v7 = vadd.f32 %v793_v50, %v745_v59  ;;  %v725_v50 = vadd.f32 %v2742_v56, %v561_v58  ;;  %v1848_v56 = vld [vmem:[%s3069_s0 + $0x18] sm:$0xff]  ;;  %v2031_v59 = vld [vmem:[%s3070_s1 + $0x30] sm:$0xff] }
 0x271   :  { %v820_v55 = vmax.f32 %v794_v7, 0.0  ;;  %v774_v18 = vadd.f32 %v2752_v27, %v725_v50  ;;  %v923_v27 = vpack.c.bf16 %v1848_v56, %v1847_v20 }
 0x273   :  { %v833_v6 = vpack.c.bf16 %v820_v55, %v819_v29  ;;  %v812_v15 = vmax.f32 %v774_v18, 0.0 }
 0x275   :  { %v829_v36 = vpack.c.bf16 %v812_v15, %v811_v22 }
 0x276   :  { %v796_v0 = vpop.f32.mrf.mxu2 }
 0x277   :  { %v797_v52 = vadd.f32 %v796_v0, %v748_v28  ;;  %v830_v0 = vpack.c.bf16 %v814_v24, %v813_v33 }
 0x279   :  { %v821_v30 = vmax.f32 %v797_v52, 0.0 }
 0x27e   :  { %v798_v2 = vpop.f32.mrf.mxu2 }
 0x27f   :  { %v799_v23 = vadd.f32 %v798_v2, %v750_v57  ;;  %v2789_v2 = vpop.permute.xlu0 %1061 }
 0x281   :  { %v822_v13 = vmax.f32 %v799_v23, 0.0 }
 0x283   :  { %v834_v31 = vpack.c.bf16 %v822_v13, %v821_v30 }
 0x286   :  { %v801_v10 = vpop.f32.mrf.mxu2 }
 0x287   :  { %v802_v60 = vadd.f32 %v801_v10, %v753_v49  ;;  %v2791_v37 = vpop.permute.xlu0 %1046  ;;  %v2025_v10 = vld [vmem:[%s3070_s1] sm:$0xff] }
 0x289   :  { %v823_v17 = vmax.f32 %v802_v60, 0.0  ;;  %v2831_v60 = vpop.permute.xlu2 %996 }
 0x28e   :  { %v803_v38 = vpop.f32.mrf.mxu2 }
 0x28f   :  { %v804_v53 = vadd.f32 %v803_v38, %v755_v12  ;;  %v2797_v25 = vpop.permute.xlu0 %971  ;;  %v2026_v38 = vld [vmem:[%s3070_s1 + $0x8] sm:$0xff]  ;;  %v2028_v12 = vld [vmem:[%s3070_s1 + $0x18] sm:$0xff] }
 0x291   :  { %v824_v42 = vmax.f32 %v804_v53, 0.0  ;;  %v2029_v53 = vld [vmem:[%s3070_s1 + $0x20] sm:$0xff]  ;;  %v2841_v23 = vpop.permute.xlu2 %1071 }
 0x293   :  { %v835_v45 = vpack.c.bf16 %v824_v42, %v823_v17 }
 0x296   :  { %v806_v40 = vpop.f32.mrf.mxu2 }
 0x297   :  { %v807_v47 = vadd.f32 %v806_v40, %v758_v43  ;;  %v2802_v39 = vpop.permute.xlu0 %956 }
 0x299   :  { %v825_v62 = vmax.f32 %v807_v47, 0.0  ;;  %v2819_v47 = vpop.permute.xlu1 %1066  ;;  %v2850_v52 = vpop.permute.xlu2 %1056 }
 0x29e   :  { %v808_v48 = vpop.f32.mrf.mxu2 }
 0x29f   :  { %v809_v54 = vadd.f32 %v808_v48, %v760_v46  ;;  %v2805_v40 = vpop.permute.xlu0 %1031 }
 0x2a1   :  { %v826_v5 = vmax.f32 %v809_v54, 0.0  ;;  %v2821_v49 = vpop.permute.xlu1 %991  ;;  %v2855_v13 = vpop.permute.xlu2 %981 }
 0x2a3   :  { %v836_v9 = vpack.c.bf16 %v826_v5, %v825_v62  ;;  %v2030_v5 = vld [vmem:[%s3070_s1 + $0x28] sm:$0xff] }
 0x2a5   :  { %842 = vmatpush.bf16.msra.mxu3 %v836_v9 }
 0x2a7   :  { %v2811_v43 = vpop.permute.xlu0 %1016 }
 0x2a9   :  { %843 = vmatpush.bf16.msra.mxu3 %v835_v45  ;;  %v2829_v57 = vpop.permute.xlu1 %976  ;;  %v2863_v51 = vpop.permute.xlu2 %966 }
 0x2ad   :  { %844 = vmatpush.bf16.msra.mxu3 %v834_v31 }
 0x2af   :  { %v942_v46 = vpop.permute.xlu0 %941 }
 0x2b1   :  { %845 = vmatpush.bf16.msra.mxu3 %v833_v6  ;;  %v2838_v28 = vpop.permute.xlu1 %1051  ;;  %v2867_v1 = vpop.permute.xlu2 %1041  ;;  %v2033_v6 = vld [vmem:[%s3070_s1 + $0x40] sm:$0xff] }
 0x2b5   :  { %846 = vmatpush.bf16.msra.mxu3 %v832_v32 }
 0x2b7   :  { %v927_v48 = vpop.permute.xlu0 %926 }
 0x2b9   :  { %847 = vmatpush.bf16.msra.mxu3 %v831_v14  ;;  %v2845_v9 = vpop.permute.xlu1 %1036  ;;  %v2875_v26 = vpop.permute.xlu2 %1026 }
 0x2bd   :  { %848 = vmatpush.bf16.msra.mxu3 %v830_v0 }
 0x2bf   :  { %v2827_v54 = vpop.permute.xlu0 %1458 }
 0x2c1   :  { %849 = vmatpush.bf16.msra.mxu3 %v829_v36  ;;  %v962_v7 = vpop.permute.xlu1 %961  ;;  %v952_v14 = vpop.permute.xlu2 %951 }
 0x2c4   :  { %850 = vmatmul.bf16.vlgmr.msra.gmra.mxu3 %v827_v35 }
 0x2c5   :  { %1219 = vmatpush.bf16.msrb.mxu3 %v923_v27  ;;  %v2035_v27 = vld [vmem:[%s3070_s1 + $0x50] sm:$0xff] }
 0x2c7   :  { %v2833_v62 = vpop.permute.xlu0 %1433 }
 0x2c9   :  { %v947_v30 = vpop.permute.xlu1 %946  ;;  %v937_v0 = vpop.permute.xlu2 %936 }
 0x2cf   :  { %v2843_v42 = vpop.permute.xlu0 %1428 }
 0x2d1   :  { %v2865_v29 = vpop.permute.xlu1 %1021 }
 0x2d4   :  { %1913 = vmatmul.msk.bf16.vlgmr.msrb.gmra.mxu3 %vm335_vm0, %v2025_v10 }
 0x2d7   :  { %v2852_v17 = vpop.permute.xlu0 %1403 }
 0x2d9   :  { %v2873_v4 = vpop.permute.xlu1 %1006 }
 0x2df   :  { %v2857_v45 = vpop.permute.xlu0 %1398 }
 0x2e1   :  { %v932_v32 = vpop.permute.xlu1 %931 }
 0x2e4   :  { %1914 = vmatmul.msk.bf16.gmra.mxu3 %vm335_vm0, %v2026_v38 }
 0x2e7   :  { %v840_v55 = vpop.permute.xlu0 %839 }
 0x2f4   :  { %1915 = vmatmul.msk.bf16.gmra.mxu3 %vm335_vm0, %v2027_v41 }
 0x304   :  { %1916 = vmatmul.msk.bf16.gmra.mxu3 %vm335_vm0, %v2028_v12 }
 0x314   :  { %1917 = vmatmul.msk.bf16.gmra.mxu3 %vm335_vm0, %v2029_v53  ;;  %v2036_v53 = vld [vmem:[%s3070_s1 + $0x58] sm:$0xff] }
 0x324   :  { %1918 = vmatmul.msk.bf16.gmra.mxu3 %vm335_vm0, %v2030_v5 }
 0x334   :  { %1919 = vmatmul.msk.bf16.gmra.mxu3 %vm335_vm0, %v2031_v59 }
 0x344   :  { %1920 = vmatmul.msk.bf16.gmra.mxu3 %vm335_vm0, %v2032_v19 }
 0x347   :  { %v851_v31 = vpop.f32.mrf.mxu3 }
 0x348   :  { %v852_v3 = vadd.f32 %v851_v31, %v840_v55 }
 0x34a   :  { %855 = vst [vmem:[#allocation2] sm:$0xff] %v852_v3 }
 0x34f   :  { %v853_v11 = vpop.f32.mrf.mxu3 }
 0x354   :  { %1921 = vmatmul.msk.bf16.gmra.mxu3 %vm335_vm0, %v2033_v6 }
 0x357   :  { %v1221_v34 = vpop.f32.mrf.mxu3 }
 0x358   :  { %v1222_v8 = vadd.f32 %v1221_v34, %v927_v48 }
 0x35a   :  { %v1301_v18 = vmax.f32 %v1222_v8, 0.0 }
 0x35f   :  { %v1223_v58 = vpop.f32.mrf.mxu3 }
 0x360   :  { %v1224_v50 = vadd.f32 %v1223_v58, %v932_v32  ;;  %v2038_v58 = vld [vmem:[%s3070_s1 + $0x68] sm:$0xff] }
 0x362   :  { %v1302_v24 = vmax.f32 %v1224_v50, 0.0 }
 0x364   :  { %1922 = vmatmul.msk.bf16.gmra.mxu3 %vm335_vm0, %v2034_v63  ;;  %v2881_v33 = vpack.c.bf16 %v1302_v24, %v1301_v18  ;;  %v2040_v24 = vld [vmem:[%s3070_s1 + $0x78] sm:$0xff] }
 0x367   :  { %v1226_v15 = vpop.f32.mrf.mxu3 }
 0x368   :  { %v1227_v20 = vadd.f32 %v1226_v15, %v937_v0 }
 0x36a   :  { %v1303_v36 = vmax.f32 %v1227_v20, 0.0 }
 0x36f   :  { %v1228_v56 = vpop.f32.mrf.mxu3 }
 0x370   :  { %v1229_v22 = vadd.f32 %v1228_v56, %v942_v46 }
 0x372   :  { %v1304_v35 = vmax.f32 %v1229_v22, 0.0 }
 0x374   :  { %1923 = vmatmul.msk.bf16.gmra.mxu3 %vm335_vm0, %v2035_v27  ;;  %v2887_v10 = vpack.c.bf16 %v1304_v35, %v1303_v36 }
 0x377   :  { %v1231_v38 = vpop.f32.mrf.mxu3 }
 0x378   :  { %v1232_v41 = vadd.f32 %v1231_v38, %v947_v30  ;;  %v2037_v30 = vld [vmem:[%s3070_s1 + $0x60] sm:$0xff] }
 0x37a   :  { %v1305_v5 = vmax.f32 %v1232_v41, 0.0 }
 0x37f   :  { %v1233_v12 = vpop.f32.mrf.mxu3 }
 0x380   :  { %v1234_v48 = vadd.f32 %v1233_v12, %v952_v14 }
 0x382   :  { %v1306_v46 = vmax.f32 %v1234_v48, 0.0 }
 0x384   :  { %1924 = vmatmul.msk.bf16.gmra.mxu3 %vm335_vm0, %v2036_v53  ;;  %v1367_v59 = vpack.c.bf16 %v1306_v46, %v1305_v5 }
 0x387   :  { %v1236_v19 = vpop.f32.mrf.mxu3 }
 0x388   :  { %v1237_v55 = vadd.f32 %v1236_v19, %v2802_v39 }
 0x38a   :  { %v1307_v11 = vmax.f32 %v1237_v55, 0.0 }
 0x38f   :  { %v1238_v31 = vpop.f32.mrf.mxu3 }
 0x390   :  { %v1239_v3 = vadd.f32 %v1238_v31, %v962_v7  ;;  %v2039_v7 = vld [vmem:[%s3070_s1 + $0x70] sm:$0xff]  ;;  %v1012_v31 = vpop.permute.xlu2 %1011 }
 0x392   :  { %v1308_v6 = vmax.f32 %v1239_v3, 0.0 }
 0x394   :  { %1925 = vmatmul.msk.bf16.gmra.mxu3 %vm335_vm0, %v2037_v30  ;;  %v1368_v34 = vpack.c.bf16 %v1308_v6, %v1307_v11 }
 0x397   :  { %v1241_v8 = vpop.f32.mrf.mxu3 }
 0x39f   :  { %v1243_v32 = vpop.f32.mrf.mxu3 }
 0x3a4   :  { %1926 = vmatmul.msk.bf16.gmra.mxu3 %vm335_vm0, %v2038_v58 }
 0x3a7   :  { %v1246_v39 = vpop.f32.mrf.mxu3 }
 0x3a8   :  { %v1247_v12 = vadd.f32 %v1246_v39, %v2829_v57 }
 0x3af   :  { %v1248_v50 = vpop.f32.mrf.mxu3 }
 0x3b0   :  { %v1249_v35 = vadd.f32 %v1248_v50, %v2855_v13 }
 0x3b2   :  { %v1312_v5 = vmax.f32 %v1249_v35, 0.0 }
 0x3b4   :  { %1927 = vmatmul.msk.bf16.gmra.mxu3 %vm335_vm0, %v2039_v7 }
 0x3b7   :  { %v1251_v63 = vpop.f32.mrf.mxu3 }
 0x3b8   :  { %v1252_v22 = vadd.f32 %v1251_v63, %v2777_v21  ;;  %v1939_v63 = vld [vmem:[%s3072_s3 + $0x10] sm:$0xf] }
 0x3ba   :  { %v1313_v48 = vmax.f32 %v1252_v22, 0.0  ;;  %v2046_v22 = vld [vmem:[%s3072_s3 + $0x24] sm:$0xf0] }
 0x3bf   :  { %v1253_v18 = vpop.f32.mrf.mxu3 }
 0x3c0   :  { %v1254_v20 = vadd.f32 %v1253_v18, %v2821_v49  ;;  %v1242_v49 = vadd.f32 %v1241_v8, %v2863_v51  ;;  %v2042_v8 = vld [vmem:[%s3072_s3 + $0x4] sm:$0xf0]  ;;  %v2044_v18 = vld [vmem:[%s3072_s3 + $0x14] sm:$0xf0] }
 0x3c2   :  { %v1314_v38 = vmax.f32 %v1254_v20, 0.0  ;;  %v1309_v55 = vmax.f32 %v1242_v49, 0.0 }
 0x3c4   :  { %1928 = vmatmul.msk.bf16.gmra.mxu3 %vm335_vm0, %v2040_v24  ;;  %v1371_v46 = vpack.c.bf16 %v1314_v38, %v1313_v48  ;;  %v2048_v48 = vld [vmem:[%s3072_s3 + $0x34] sm:$0xf0] }
 0x3c7   :  { %v1256_v14 = vpop.f32.mrf.mxu3 }
 0x3c8   :  { %v1257_v15 = vadd.f32 %v1256_v14, %v2831_v60  ;;  %v1244_v60 = vadd.f32 %v1243_v32, %v2797_v25  ;;  %v1940_v14 = vor.u32 %v2044_v18, %v1939_v63 }
 0x3ca   :  { %v1315_v27 = vmax.f32 %v1257_v15, 0.0  ;;  %v1310_v21 = vmax.f32 %v1244_v60, 0.0 }
 0x3cc   :  { %v1369_v30 = vpack.c.bf16 %v1310_v21, %v1309_v55  ;;  %v2052_v55 = vld [vmem:[%s3072_s3 + $0x54] sm:$0xf0] }
 0x3cf   :  { %v1258_v0 = vpop.f32.mrf.mxu3 }
 0x3d0   :  { %v1259_v56 = vadd.f32 %v1258_v0, %v2769_v16  ;;  %v1311_v16 = vmax.f32 %v1247_v12, 0.0 }
 0x3d2   :  { %v1316_v36 = vmax.f32 %v1259_v56, 0.0  ;;  %v1370_v19 = vpack.c.bf16 %v1312_v5, %v1311_v16  ;;  %v1947_v56 = vld [vmem:[%s3072_s3 + $0x20] sm:$0xf] }
 0x3d4   :  { %v1372_v41 = vpack.c.bf16 %v1316_v36, %v1315_v27  ;;  %v1948_v36 = vor.u32 %v2046_v22, %v1947_v56  ;;  %v1949_v56 = vld [vmem:[%s3072_s3 + $0x28] sm:$0xf0]  ;;  %v2047_v22 = vld [vmem:[%s3072_s3 + $0x34] sm:$0xf] }
 0x3d6   :  { %1541 = vmatpush.bf16.msrb.mxu1 %v1372_v41 }
 0x3d7   :  { %v1261_v53 = vpop.f32.mrf.mxu3 }
 0x3d8   :  { %v1262_v13 = vadd.f32 %v1261_v53, %v2873_v4  ;;  %v1931_v4 = vld [vmem:[%s3072_s3] sm:$0xf] }
 0x3d9   :  { %v1932_v50 = vor.u32 %v2042_v8, %v1931_v4 }
 0x3da   :  { %1542 = vmatpush.bf16.msrb.mxu1 %v1371_v46  ;;  %v1317_v11 = vmax.f32 %v1262_v13, 0.0  ;;  %v2050_v46 = vld [vmem:[%s3072_s3 + $0x44] sm:$0xf0] }
 0x3de   :  { %1543 = vmatpush.bf16.msrb.mxu1 %v1370_v19  ;;  %v1971_v19 = vld [vmem:[%s3072_s3 + $0x50] sm:$0xf] }
 0x3df   :  { %v1263_v3 = vpop.f32.mrf.mxu3 }
 0x3e0   :  { %v1264_v57 = vadd.f32 %v1263_v3, %v1012_v31  ;;  %v1972_v31 = vor.u32 %v2052_v55, %v1971_v19  ;;  %v1989_v19 = vld [vmem:[%s3072_s3 + $0x78] sm:$0xf0] }
 0x3e2   :  { %v1318_v6 = vmax.f32 %v1264_v57, 0.0  ;;  %1544 = vmatpush.bf16.msrb.mxu1 %v1369_v30  ;;  %v1979_v30 = vld [vmem:[%s3072_s3 + $0x60] sm:$0xf] }
 0x3e4   :  { %v2919_v25 = vpack.c.bf16 %v1318_v6, %v1317_v11  ;;  %v2054_v11 = vld [vmem:[%s3072_s3 + $0x64] sm:$0xf0] }
 0x3e5   :  { %v1980_v4 = vor.u32 %v2054_v11, %v1979_v30 }
 0x3e6   :  { %1545 = vmatpush.bf16.msrb.mxu1 %v1368_v34 }
 0x3e7   :  { %v1266_v32 = vpop.f32.mrf.mxu3 }
 0x3e8   :  { %v1267_v51 = vadd.f32 %v1266_v32, %v2811_v43 }
 0x3ea   :  { %1546 = vmatpush.bf16.msrb.mxu1 %v1367_v59  ;;  %v1319_v7 = vmax.f32 %v1267_v51, 0.0 }
 0x3ee   :  { %1547 = vmatpush.bf16.msrb.mxu1 %v2887_v10 }
 0x3ef   :  { %v1268_v58 = vpop.f32.mrf.mxu3 }
 0x3f0   :  { %v1269_v39 = vadd.f32 %v1268_v58, %v2865_v29 }
 0x3f2   :  { %v1320_v34 = vmax.f32 %v1269_v39, 0.0  ;;  %1548 = vmatpush.bf16.msrb.mxu1 %v2881_v33 }
 0x3f4   :  { %v2931_v59 = vpack.c.bf16 %v1320_v34, %v1319_v7 }
 0x3f5   :  { %1549 = vmatmul.bf16.vlgmr.msrb.gmra.mxu1 %v1932_v50 }
 0x3f7   :  { %v1271_v43 = vpop.f32.mrf.mxu3 }
 0x3f8   :  { %v1272_v10 = vadd.f32 %v1271_v43, %v2875_v26 }
 0x3fa   :  { %v1321_v15 = vmax.f32 %v1272_v10, 0.0 }
 0x3ff   :  { %v1273_v29 = vpop.f32.mrf.mxu3 }
 0x400   :  { %v1274_v24 = vadd.f32 %v1273_v29, %v2805_v40 }
 0x402   :  { %v1322_v33 = vmax.f32 %v1274_v24, 0.0 }
 0x404   :  { %v2941_v0 = vpack.c.bf16 %v1322_v33, %v1321_v15  ;;  %v1933_v15 = vld [vmem:[%s3072_s3 + $0x8] sm:$0xf0] }
 0x405   :  { %1554 = vmatmul.bf16.gmra.mxu1 %v1940_v14 }
 0x407   :  { %v1276_v20 = vpop.f32.mrf.mxu3 }
 0x408   :  { %v1277_v26 = vadd.f32 %v1276_v20, %v2845_v9  ;;  %v1955_v9 = vld [vmem:[%s3072_s3 + $0x30] sm:$0xf]  ;;  %v2043_v20 = vld [vmem:[%s3072_s3 + $0x14] sm:$0xf] }
 0x409   :  { %v1956_v60 = vor.u32 %v2048_v48, %v1955_v9  ;;  %v3028_v48 = vpop.permute.xlu2 %1453 }
 0x40a   :  { %v1323_v35 = vmax.f32 %v1277_v26, 0.0  ;;  %v2045_v26 = vld [vmem:[%s3072_s3 + $0x24] sm:$0xf] }
 0x40f   :  { %v1278_v27 = vpop.f32.mrf.mxu3 }
 0x410   :  { %v1279_v40 = vadd.f32 %v1278_v27, %v2867_v1  ;;  %v1963_v1 = vld [vmem:[%s3072_s3 + $0x40] sm:$0xf]  ;;  %v1957_v27 = vld [vmem:[%s3072_s3 + $0x38] sm:$0xf0] }
 0x411   :  { %v1964_v16 = vor.u32 %v2050_v46, %v1963_v1  ;;  %v3038_v46 = vpop.permute.xlu2 %1448 }
 0x412   :  { %v1324_v38 = vmax.f32 %v1279_v40, 0.0  ;;  %v1960_v40 = vor.u32 %v2047_v22, %v1957_v27 }
 0x414   :  { %v1376_v41 = vpack.c.bf16 %v1324_v38, %v1323_v35  ;;  %v1965_v35 = vld [vmem:[%s3072_s3 + $0x48] sm:$0xf0] }
 0x415   :  { %1559 = vmatmul.bf16.gmra.mxu1 %v1948_v36  ;;  %v2049_v36 = vld [vmem:[%s3072_s3 + $0x44] sm:$0xf] }
 0x416   :  { %v1968_v38 = vor.u32 %v2049_v36, %v1965_v35 }
 0x417   :  { %v1281_v12 = vpop.f32.mrf.mxu3 }
 0x419   :  { %v1424_v55 = vpop.permute.xlu2 %1423 }
 0x41f   :  { %v1283_v53 = vpop.f32.mrf.mxu3 }
 0x420   :  { %v1284_v10 = vadd.f32 %v1283_v53, %v2838_v28  ;;  %v3030_v53 = vpop.permute.xlu1 %1443 }
 0x425   :  { %1564 = vmatmul.bf16.gmra.mxu1 %v1956_v60  ;;  %v2053_v60 = vld [vmem:[%s3072_s3 + $0x64] sm:$0xf] }
 0x427   :  { %v1286_v5 = vpop.f32.mrf.mxu3 }
 0x428   :  { %v1287_v34 = vadd.f32 %v1286_v5, %v2850_v52  ;;  %v2056_v52 = vld [vmem:[%s3072_s3 + $0x74] sm:$0xf0]  ;;  %v1981_v5 = vld [vmem:[%s3072_s3 + $0x68] sm:$0xf0] }
 0x429   :  { %v1984_v1 = vor.u32 %v2053_v60, %v1981_v5 }
 0x42a   :  { %v1327_v18 = vmax.f32 %v1287_v34, 0.0 }
 0x42f   :  { %v1288_v49 = vpop.f32.mrf.mxu3 }
 0x435   :  { %1569 = vmatmul.bf16.gmra.mxu1 %v1964_v16  ;;  %v3040_v16 = vpop.permute.xlu1 %1438 }
 0x437   :  { %v1291_v21 = vpop.f32.mrf.mxu3 }
 0x438   :  { %v1292_v8 = vadd.f32 %v1291_v21, %v2819_v47  ;;  %v1326_v47 = vmax.f32 %v1284_v10, 0.0  ;;  %v2055_v21 = vld [vmem:[%s3072_s3 + $0x74] sm:$0xf] }
 0x43a   :  { %v1329_v43 = vmax.f32 %v1292_v8, 0.0 }
 0x43f   :  { %v1293_v13 = vpop.f32.mrf.mxu3 }
 0x440   :  { %v1294_v32 = vadd.f32 %v1293_v13, %v2841_v23 }
 0x442   :  { %v1330_v50 = vmax.f32 %v1294_v32, 0.0 }
 0x444   :  { %v1379_v23 = vpack.c.bf16 %v1330_v50, %v1329_v43 }
 0x445   :  { %1574 = vmatmul.bf16.gmra.mxu1 %v1972_v31  ;;  %v1992_v31 = vor.u32 %v2055_v21, %v1989_v19 }
 0x447   :  { %v1296_v3 = vpop.f32.mrf.mxu3 }
 0x448   :  { %v1297_v57 = vadd.f32 %v1296_v3, %v2764_v61  ;;  %v1289_v61 = vadd.f32 %v1288_v49, %v2789_v2  ;;  %v1987_v2 = vld [vmem:[%s3072_s3 + $0x70] sm:$0xf]  ;;  %v1414_v3 = vpop.permute.xlu1 %1413 }
 0x449   :  { %v1988_v28 = vor.u32 %v2056_v52, %v1987_v2 }
 0x44a   :  { %v1331_v58 = vmax.f32 %v1297_v57, 0.0  ;;  %v1328_v63 = vmax.f32 %v1289_v61, 0.0  ;;  %v1419_v57 = vpop.permute.xlu2 %1418 }
 0x44c   :  { %v1378_v29 = vpack.c.bf16 %v1328_v63, %v1327_v18 }
 0x44f   :  { %v1298_v6 = vpop.f32.mrf.mxu3 }
 0x450   :  { %v1299_v51 = vadd.f32 %v1298_v6, %v2813_v44  ;;  %v1282_v44 = vadd.f32 %v1281_v12, %v2791_v37  ;;  %v2041_v37 = vld [vmem:[%s3072_s3 + $0x4] sm:$0xf]  ;;  %v1973_v12 = vld [vmem:[%s3072_s3 + $0x58] sm:$0xf0]  ;;  %v1409_v11 = vpop.permute.xlu1 %1408 }
 0x451   :  { %v1936_v33 = vor.u32 %v2041_v37, %v1933_v15 }
 0x452   :  { %v1332_v39 = vmax.f32 %v1299_v51, 0.0  ;;  %v1325_v24 = vmax.f32 %v1282_v44, 0.0  ;;  %v1394_v6 = vpop.permute.xlu2 %1393 }
 0x454   :  { %v1380_v7 = vpack.c.bf16 %v1332_v39, %v1331_v58  ;;  %v1377_v14 = vpack.c.bf16 %v1326_v47, %v1325_v24 }
 0x455   :  { %1579 = vmatmul.bf16.gmra.mxu1 %v1980_v4 }
 0x456   :  { %1590 = vmatpush.bf16.msrb.mxu2 %v1380_v7 }
 0x458   :  { %v1384_v51 = vpop.permute.xlu1 %1383 }
 0x45a   :  { %1591 = vmatpush.bf16.msrb.mxu2 %v1379_v23  ;;  %v1389_v39 = vpop.permute.xlu2 %1388 }
 0x45e   :  { %1592 = vmatpush.bf16.msrb.mxu2 %v1378_v29 }
 0x462   :  { %1593 = vmatpush.bf16.msrb.mxu2 %v1377_v14 }
 0x465   :  { %1584 = vmatmul.bf16.gmra.mxu1 %v1988_v28 }
 0x466   :  { %1594 = vmatpush.bf16.msrb.mxu2 %v1376_v41  ;;  %v2051_v41 = vld [vmem:[%s3072_s3 + $0x54] sm:$0xf] }
 0x467   :  { %v1976_v9 = vor.u32 %v2051_v41, %v1973_v12 }
 0x46a   :  { %1595 = vmatpush.bf16.msrb.mxu2 %v2941_v0 }
 0x46e   :  { %1596 = vmatpush.bf16.msrb.mxu2 %v2931_v59  ;;  %v1941_v59 = vld [vmem:[%s3072_s3 + $0x18] sm:$0xf0] }
 0x46f   :  { %v1944_v0 = vor.u32 %v2043_v20, %v1941_v59 }
 0x472   :  { %1597 = vmatpush.bf16.msrb.mxu2 %v2919_v25  ;;  %v1952_v25 = vor.u32 %v2045_v26, %v1949_v56  ;;  %v1550_v49 = vpop.f32.mrf.mxu1 }
 0x473   :  { %v1551_v4 = vadd.f32 %v1550_v49, %v1384_v51 }
 0x475   :  { %1598 = vmatmul.bf16.vlgmr.msrb.gmra.mxu2 %v1936_v33 }
 0x47a   :  { %v1552_v13 = vpop.f32.mrf.mxu1 }
 0x47b   :  { %v1553_v50 = vadd.f32 %v1552_v13, %v1389_v39 }
 0x482   :  { %v1555_v30 = vpop.f32.mrf.mxu1 }
 0x483   :  { %v1556_v23 = vadd.f32 %v1555_v30, %v1394_v6 }
 0x485   :  { %1603 = vmatmul.bf16.gmra.mxu2 %v1944_v0 }
 0x48a   :  { %v1557_v32 = vpop.f32.mrf.mxu1 }
 0x48b   :  { %v1558_v29 = vadd.f32 %v1557_v32, %v2857_v45 }
 0x492   :  { %v1560_v61 = vpop.f32.mrf.mxu1 }
 0x493   :  { %v1561_v15 = vadd.f32 %v1560_v61, %v2852_v17 }
 0x495   :  { %1608 = vmatmul.bf16.gmra.mxu2 %v1952_v25 }
 0x49a   :  { %v1562_v44 = vpop.f32.mrf.mxu1 }
 0x49b   :  { %v1563_v0 = vadd.f32 %v1562_v44, %v1409_v11 }
 0x4a2   :  { %v1565_v52 = vpop.f32.mrf.mxu1 }
 0x4a3   :  { %v1566_v45 = vadd.f32 %v1565_v52, %v1414_v3 }
 0x4a5   :  { %1613 = vmatmul.bf16.gmra.mxu2 %v1960_v40 }
 0x4aa   :  { %v1567_v59 = vpop.f32.mrf.mxu1 }
 0x4b2   :  { %v1570_v40 = vpop.f32.mrf.mxu1 }
 0x4b5   :  { %1618 = vmatmul.bf16.gmra.mxu2 %v1968_v38  ;;  %v1568_v38 = vadd.f32 %v1567_v59, %v1419_v57 }
 0x4ba   :  { %v1572_v41 = vpop.f32.mrf.mxu1 }
 0x4c2   :  { %v1575_v19 = vpop.f32.mrf.mxu1 }
 0x4c5   :  { %1623 = vmatmul.bf16.gmra.mxu2 %v1976_v9 }
 0x4d5   :  { %1628 = vmatmul.bf16.gmra.mxu2 %v1984_v1  ;;  %v1571_v1 = vadd.f32 %v1570_v40, %v1424_v55 }
 0x4e5   :  { %1633 = vmatmul.bf16.gmra.mxu2 %v1992_v31  ;;  %v1577_v31 = vpop.f32.mrf.mxu1 }
 0x4ed   :  { %v1580_v11 = vpop.f32.mrf.mxu1 }
 0x4f5   :  { %v1582_v32 = vpop.f32.mrf.mxu1 }
 0x4f6   :  { %v1583_v39 = vadd.f32 %v1582_v32, %v3038_v46  ;;  %v1573_v46 = vadd.f32 %v1572_v41, %v2843_v42  ;;  %v1668_v42 = vpop.permute.xlu1 %1667 }
 0x4f8   :  { %v1599_v8 = vpop.f32.mrf.mxu2 }
 0x4f9   :  { %v1600_v58 = vadd.f32 %v1599_v8, %v1551_v4 }
 0x4fb   :  { %v1639_v43 = vmax.f32 %v1600_v58, 0.0 }
 0x4fd   :  { %v1585_v4 = vpop.f32.mrf.mxu1 }
 0x4fe   :  { %v1586_v58 = vadd.f32 %v1585_v4, %v3028_v48 }
 0x500   :  { %v1601_v7 = vpop.f32.mrf.mxu2 }
 0x501   :  { %v1602_v34 = vadd.f32 %v1601_v7, %v1553_v50  ;;  %v1581_v7 = vadd.f32 %v1580_v11, %v3030_v53 }
 0x503   :  { %v1640_v10 = vmax.f32 %v1602_v34, 0.0 }
 0x505   :  { %v3048_v63 = vpack.c.bf16 %v1640_v10, %v1639_v43  ;;  %v1587_v8 = vpop.f32.mrf.mxu1  ;;  %v1578_v10 = vadd.f32 %v1577_v31, %v3040_v16 }
 0x506   :  { %v1588_v55 = vadd.f32 %v1587_v8, %v2827_v54 }
 0x508   :  { %v1604_v18 = vpop.f32.mrf.mxu2 }
 0x509   :  { %v1605_v47 = vadd.f32 %v1604_v18, %v1556_v23 }
 0x50b   :  { %v1641_v14 = vmax.f32 %v1605_v47, 0.0  ;;  %v1576_v47 = vadd.f32 %v1575_v19, %v2833_v62  ;;  %v1655_v62 = vld [vmem:[%s3074_s5] sm:$0xf] }
 0x510   :  { %v1606_v24 = vpop.f32.mrf.mxu2 }
 0x511   :  { %v1607_v2 = vadd.f32 %v1606_v24, %v1558_v29 }
 0x513   :  { %v1642_v28 = vmax.f32 %v1607_v2, 0.0 }
 0x515   :  { %v3051_v37 = vpack.c.bf16 %v1642_v28, %v1641_v14 }
 0x518   :  { %v1609_v33 = vpop.f32.mrf.mxu2 }
 0x519   :  { %v1610_v20 = vadd.f32 %v1609_v33, %v1561_v15 }
 0x51b   :  { %v1643_v25 = vmax.f32 %v1610_v20, 0.0 }
 0x520   :  { %v1611_v26 = vpop.f32.mrf.mxu2 }
 0x521   :  { %v1612_v56 = vadd.f32 %v1611_v26, %v1563_v0 }
 0x523   :  { %v1644_v22 = vmax.f32 %v1612_v56, 0.0 }
 0x525   :  { %v1659_v27 = vpack.c.bf16 %v1644_v22, %v1643_v25 }
 0x528   :  { %v1614_v36 = vpop.f32.mrf.mxu2 }
 0x529   :  { %v1615_v35 = vadd.f32 %v1614_v36, %v1566_v45 }
 0x52b   :  { %v1645_v60 = vmax.f32 %v1615_v35, 0.0 }
 0x530   :  { %v1616_v12 = vpop.f32.mrf.mxu2 }
 0x531   :  { %v1617_v9 = vadd.f32 %v1616_v12, %v1568_v38 }
 0x533   :  { %v1646_v5 = vmax.f32 %v1617_v9, 0.0 }
 0x535   :  { %v1660_v17 = vpack.c.bf16 %v1646_v5, %v1645_v60 }
 0x538   :  { %v1619_v49 = vpop.f32.mrf.mxu2 }
 0x539   :  { %v1620_v21 = vadd.f32 %v1619_v49, %v1571_v1 }
 0x53b   :  { %v1647_v33 = vmax.f32 %v1620_v21, 0.0 }
 0x540   :  { %v1621_v13 = vpop.f32.mrf.mxu2 }
 0x541   :  { %v1622_v52 = vadd.f32 %v1621_v13, %v1573_v46 }
 0x543   :  { %v1648_v15 = vmax.f32 %v1622_v52, 0.0 }
 0x545   :  { %v1661_v20 = vpack.c.bf16 %v1648_v15, %v1647_v33 }
 0x548   :  { %v1624_v30 = vpop.f32.mrf.mxu2 }
 0x549   :  { %v1625_v2 = vadd.f32 %v1624_v30, %v1576_v47 }
 0x54b   :  { %v1649_v28 = vmax.f32 %v1625_v2, 0.0 }
 0x550   :  { %v1626_v6 = vpop.f32.mrf.mxu2 }
 0x551   :  { %v1627_v29 = vadd.f32 %v1626_v6, %v1578_v10 }
 0x553   :  { %v1650_v14 = vmax.f32 %v1627_v29, 0.0 }
 0x555   :  { %v1662_v16 = vpack.c.bf16 %v1650_v14, %v1649_v28 }
 0x558   :  { %v1629_v3 = vpop.f32.mrf.mxu2 }
 0x559   :  { %v1630_v23 = vadd.f32 %v1629_v3, %v1581_v7 }
 0x55b   :  { %v1651_v54 = vmax.f32 %v1630_v23, 0.0 }
 0x560   :  { %v1631_v51 = vpop.f32.mrf.mxu2 }
 0x561   :  { %v1632_v34 = vadd.f32 %v1631_v51, %v1583_v39 }
 0x563   :  { %v1652_v24 = vmax.f32 %v1632_v34, 0.0 }
 0x565   :  { %v1663_v53 = vpack.c.bf16 %v1652_v24, %v1651_v54 }
 0x568   :  { %v1634_v57 = vpop.f32.mrf.mxu2 }
 0x569   :  { %v1635_v61 = vadd.f32 %v1634_v57, %v1586_v58 }
 0x56b   :  { %v1653_v44 = vmax.f32 %v1635_v61, 0.0 }
 0x570   :  { %v1636_v50 = vpop.f32.mrf.mxu2 }
 0x571   :  { %v1637_v43 = vadd.f32 %v1636_v50, %v1588_v55 }
 0x573   :  { %v1654_v18 = vmax.f32 %v1637_v43, 0.0 }
 0x575   :  { %v1664_v48 = vpack.c.bf16 %v1654_v18, %v1653_v44 }
 0x577   :  { %1670 = vmatpush.bf16.msrb.mxu0 %v1664_v48 }
 0x57b   :  { %1671 = vmatpush.bf16.msrb.mxu0 %v1663_v53 }
 0x57f   :  { %1672 = vmatpush.bf16.msrb.mxu0 %v1662_v16 }
 0x583   :  { %1673 = vmatpush.bf16.msrb.mxu0 %v1661_v20 }
 0x587   :  { %1674 = vmatpush.bf16.msrb.mxu0 %v1660_v17 }
 0x58b   :  { %1675 = vmatpush.bf16.msrb.mxu0 %v1659_v27 }
 0x58f   :  { %1676 = vmatpush.bf16.msrb.mxu0 %v3051_v37 }
 0x593   :  { %1677 = vmatpush.bf16.msrb.mxu0 %v3048_v63 }
 0x596   :  { %1678 = vmatmul.bf16.vlgmr.msrb.gmra.mxu0 %v1655_v62 }
 0x613   :  { %v1679_v59 = vpop.f32.mrf.mxu0 }
 0x614   :  { %v1680_v0 = vadd.f32 %v1679_v59, %v1668_v42 }
 0x616   :  { %1684 = vst [vmem:[#allocation2 + $0x8] sm:$0xff] %v1680_v0 }
 0x617   :  { %1697 = dma.vmem_to_hbm [thread:$0]  %s1690_s20, 256, %s1692_s4, [#allocation3], %s2092_s23, %s2092_s23, %s2093_s24  }
 0x61b   :  { %v1681_v63 = vpop.f32.mrf.mxu0 }
 0x61c   :  { %2088 = dma.done.wait [#allocation3], 256  }
 0x61d   :  { %2089 = vsyncadd [#allocation3], 4294967040 }
 0x61e   :  { %1702 = vsyncpa [#allocation3], 1 }

</bundles_post_ra>
